<compile_context>
chip_gen: v5e
topology: v5e:2x2
jax: 0.10.0
libtpu: 0.0.40
codegen_flags: <defaults>
</compile_context>

<pallas_src>
import functools

import jax
import jax.numpy as jnp
from jax.experimental import pallas as pl
from jax.experimental.pallas import tpu as pltpu


def _round_up(x, m):
    return (x + m - 1) // m * m


# ---------------------------------------------------------------------------
# Fused kernel: (h0, c0) init from z at chunk 0, then Tc LSTM steps per grid
# step with the input projection computed on the fly (no gx HBM round trip).
# ---------------------------------------------------------------------------
def _decoder_lstm_kernel(x_ref, w_ih_ref, w_hh_ref, b_ref,
                         z_ref, wz_ref, bz_ref,
                         out_ref, hT_ref, cT_ref,
                         h_sc, c_sc):
    c_idx = pl.program_id(1)                 # time-chunk index (sequential)
    Tc, Bb, _ = x_ref.shape
    Hp = h_sc.shape[1]                       # lane-padded hidden size

    # (h0, c0) = chunk(tanh(z @ Wz^T + bz), 2): once per batch block.
    @pl.when(c_idx == 0)
    def _():
        hc = jnp.tanh(
            jnp.dot(z_ref[...], wz_ref[...],
                    preferred_element_type=jnp.float32) + bz_ref[...])
        h_sc[...] = hc[:, :Hp]
        c_sc[...] = hc[:, Hp:]

    # Hoist weight loads and the bias broadcast out of the time loop.
    w_ih = w_ih_ref[...]                                     # (I, 4Hp)  bf16
    w_hh = w_hh_ref[...]                                     # (Hp, 4Hp) bf16
    bias = jnp.broadcast_to(b_ref[...], (Bb, 4 * Hp))        # (Bb, 4Hp) f32

    def step(t, carry):
        x_t = x_ref[t]                                       # (Bb, I)   bf16
        h = h_sc[...]
        gates = (jnp.dot(x_t, w_ih, preferred_element_type=jnp.float32)
                 + jnp.dot(h.astype(w_hh.dtype), w_hh,
                           preferred_element_type=jnp.float32)
                 + bias)                                     # (Bb, 4Hp) f32
        # Gate order [i, f, o, g]: one sigmoid over a lane-aligned (Bb, 3Hp)
        # slice, one tanh over the trailing (Bb, Hp) slice.
        ifo = jax.nn.sigmoid(gates[:, :3 * Hp])
        g_g = jnp.tanh(gates[:, 3 * Hp:])
        i_g = ifo[:, :Hp]
        f_g = ifo[:, Hp:2 * Hp]
        o_g = ifo[:, 2 * Hp:]
        c_new = f_g * c_sc[...] + i_g * g_g
        h_new = o_g * jnp.tanh(c_new)
        c_sc[...] = c_new
        h_sc[...] = h_new
        # Batch-first, lane-packed writeback: column block [t*Hp, (t+1)*Hp).
        col = pl.multiple_of(t * Hp, 128)
        out_ref[:, pl.ds(col, Hp)] = h_new.astype(out_ref.dtype)
        return carry

    jax.lax.fori_loop(0, Tc, step, 0, unroll=min(Tc, 8))

    # Final (h_n, c_n): written exactly once, on the last time chunk.
    @pl.when(c_idx == pl.num_programs(1) - 1)
    def _():
        hT_ref[...] = h_sc[...].astype(hT_ref.dtype)
        cT_ref[...] = c_sc[...].astype(cT_ref.dtype)


# ---------------------------------------------------------------------------
# Helpers: time-chunk picker (VMEM-budgeted) and parameter preparation.
# ---------------------------------------------------------------------------
def _pick_time_chunk(T, Bb, I, C, Hp, *, cap=64, budget_bytes=28 << 20):
    """Largest divisor of T (<= cap) whose working set fits the VMEM budget.

    Inputs/outputs counted double-buffered. Always returns >= 1, so a prime T
    degrades gracefully (Tc=1) instead of blowing VMEM.
    """
    fixed = (2 * (I + Hp) * 4 * Hp * 2       # W_ih^T + W_hh^T (bf16, 2 bufs)
             + 2 * C * 2 * Hp * 4            # Wz^T (f32, 2 bufs)
             + 2 * (4 * Hp + 2 * Hp) * 4     # biases
             + 2 * Bb * C * 4                # z block
             + 2 * 2 * Bb * Hp * 4           # h_n / c_n output blocks
             + 2 * Bb * Hp * 4               # h / c carry scratch
             + (1 << 20))                    # compiler-internal slack
    best = 1
    for tc in range(1, min(T, cap) + 1):
        if T % tc:
            continue
        per_chunk = 2 * tc * Bb * I * 2 + 2 * Bb * tc * Hp * 4
        if fixed + per_chunk <= budget_bytes:
            best = tc
    return best


def _prepare_kernel_params(p, matmul_dtype=jnp.bfloat16):
    """PyTorch-layout params -> kernel layout.

    Gate order [i,f,g,o] -> [i,f,o,g]; H zero-padded per gate to a multiple of
    128 (exact); matmul weights transposed and cast to bf16.
    """
    H = p["w_hh"].shape[1]
    Hp = _round_up(H, 128)
    perm = jnp.array([0, 1, 3, 2])           # i, f, o, g  from  i, f, g, o

    def gate_fix(w):                         # (4H, ...) -> (4Hp, ...)
        wb = w.reshape((4, H) + w.shape[1:])[perm]
        pad = [(0, 0)] * wb.ndim
        pad[1] = (0, Hp - H)
        return jnp.pad(wb, pad).reshape((4 * Hp,) + w.shape[1:])

    def half_fix(w):                         # (2H, ...) -> (2Hp, ...)
        wb = w.reshape((2, H) + w.shape[1:])
        pad = [(0, 0)] * wb.ndim
        pad[1] = (0, Hp - H)
        return jnp.pad(wb, pad).reshape((2 * Hp,) + w.shape[1:])

    w_ih = gate_fix(p["w_ih"])                               # (4Hp, I)
    w_hh = jnp.pad(gate_fix(p["w_hh"]), ((0, 0), (0, Hp - H)))  # (4Hp, Hp)
    b = gate_fix(p["b_ih"] + p["b_hh"])                      # (4Hp,)
    wz = half_fix(p["wz"])                                   # (2Hp, C)
    bz = half_fix(p["bz"])                                   # (2Hp,)

    return {
        "w_ih_t": w_ih.T.astype(matmul_dtype),               # (I, 4Hp) bf16
        "w_hh_t": w_hh.T.astype(matmul_dtype),               # (Hp, 4Hp) bf16
        "b": b[None, :].astype(jnp.float32),                 # (1, 4Hp)
        "wz_t": wz.T.astype(jnp.float32),                    # (C, 2Hp)
        "bz": bz[None, :].astype(jnp.float32),               # (1, 2Hp)
    }


# ---------------------------------------------------------------------------
# Wrapper.
# ---------------------------------------------------------------------------
@functools.partial(jax.jit, static_argnames=("chunk",))
def decoder_forward(inputs, z, params, *, chunk=None):
    """inputs: (B, T, input_size) batch_first; z: (1, B, code_size).

    Returns (outputs (B, T, H), (h_n (1, B, H), c_n (1, B, H))) -- same
    semantics as Decoder.forward with lengths=None, init_hidden=None and
    eval-mode dropout (identity).
    """
    B, T, I = inputs.shape
    H = params["w_hh"].shape[1]
    Hp = _round_up(H, 128)
    C = z.shape[-1]

    kp = _prepare_kernel_params(params)

    # Time-major, bf16 x for streaming (it is a matmul operand anyway); one
    # cheap XLA transpose instead of the old (B*T, 4H) f32 gx round trip.
    x_tm = jnp.transpose(inputs, (1, 0, 2)).astype(jnp.bfloat16)   # (T, B, I)
    z2 = z[0].astype(jnp.float32)                                  # (B, C)

    # Batch blocking: split across v7x's two TensorCores when each half still
    # fills >= 8 sublanes; single block otherwise (v5e / v6e, small B).
    Bb = B // 2 if (B % 16 == 0) else B
    Tc = chunk if chunk is not None else _pick_time_chunk(T, Bb, I, C, Hp)
    assert T % Tc == 0 and B % Bb == 0
    nb, nc = B // Bb, T // Tc

    cost = pl.CostEstimate(
        flops=2 * B * T * (I + Hp) * 4 * Hp + 12 * B * T * Hp
              + 2 * B * C * 2 * Hp,
        transcendentals=5 * B * T * Hp + 2 * B * Hp,
        bytes_accessed=B * T * I * 2 + B * T * Hp * 4 + 4 * B * Hp * 4
                       + (I + Hp) * 4 * Hp * 2 + C * 2 * Hp * 4 + B * C * 4,
    )

    out_flat, hT, cT = pl.pallas_call(
        _decoder_lstm_kernel,
        out_shape=(
            jax.ShapeDtypeStruct((B, T * Hp), jnp.float32),  # packed outputs
            jax.ShapeDtypeStruct((B, Hp), jnp.float32),      # h_n
            jax.ShapeDtypeStruct((B, Hp), jnp.float32),      # c_n
        ),
        grid_spec=pltpu.PrefetchScalarGridSpec(
            num_scalar_prefetch=0,
            grid=(nb, nc),
            in_specs=[
                pl.BlockSpec((Tc, Bb, I), lambda bb, c: (c, bb, 0)),  # x chunk
                pl.BlockSpec((I, 4 * Hp), lambda bb, c: (0, 0)),      # W_ih^T
                pl.BlockSpec((Hp, 4 * Hp), lambda bb, c: (0, 0)),     # W_hh^T
                pl.BlockSpec((1, 4 * Hp), lambda bb, c: (0, 0)),      # b_ih+b_hh
                pl.BlockSpec((Bb, C), lambda bb, c: (bb, 0)),         # z
                pl.BlockSpec((C, 2 * Hp), lambda bb, c: (0, 0)),      # Wz^T
                pl.BlockSpec((1, 2 * Hp), lambda bb, c: (0, 0)),      # bz
            ],
            out_specs=[
                pl.BlockSpec((Bb, Tc * Hp), lambda bb, c: (bb, c)),   # outputs
                pl.BlockSpec((Bb, Hp), lambda bb, c: (bb, 0)),        # h_n
                pl.BlockSpec((Bb, Hp), lambda bb, c: (bb, 0)),        # c_n
            ],
            scratch_shapes=[
                pltpu.VMEM((Bb, Hp), jnp.float32),   # h carry
                pltpu.VMEM((Bb, Hp), jnp.float32),   # c carry
            ],
        ),
        compiler_params=pltpu.CompilerParams(
            dimension_semantics=("parallel", "arbitrary"),
            vmem_limit_bytes=48 * 1024 * 1024),
        cost_estimate=cost,
    )(x_tm, kp["w_ih_t"], kp["w_hh_t"], kp["b"], z2, kp["wz_t"], kp["bz"])

    outputs = out_flat.reshape(B, T, Hp)[:, :, :H]     # contiguous; :H drops pad
    return outputs, (hT[:, :H][None], cT[:, :H][None])


# ---------------------------------------------------------------------------
# Pure-JAX f32 reference (PyTorch layout / gate order), for verification.
# ---------------------------------------------------------------------------
def _reference_forward(inputs, z, p):
    H = p["w_hh"].shape[1]
    hc0 = jnp.tanh(z[0] @ p["wz"].T + p["bz"])
    h0, c0 = hc0[:, :H], hc0[:, H:]
    w_ih_t = p["w_ih"].T
    w_hh_t = p["w_hh"].T
    b = p["b_ih"] + p["b_hh"]

    def step(carry, x_t):
        h, c = carry
        g = x_t @ w_ih_t + h @ w_hh_t + b
        i = jax.nn.sigmoid(g[:, 0 * H:1 * H])
        f = jax.nn.sigmoid(g[:, 1 * H:2 * H])
        gg = jnp.tanh(g[:, 2 * H:3 * H])
        o = jax.nn.sigmoid(g[:, 3 * H:4 * H])
        c_new = f * c + i * gg
        h_new = o * jnp.tanh(c_new)
        return (h_new, c_new), h_new

    (hT, cT), outs = jax.lax.scan(step, (h0, c0),
                                  jnp.transpose(inputs, (1, 0, 2)))
    return jnp.transpose(outs, (1, 0, 2)), (hT[None], cT[None])


def make_params(key, input_size, hidden_size, code_size):
    """Deterministic PyTorch-layout parameters ([i,f,g,o] gate order)."""
    k = jax.random.split(key, 6)
    s = 1.0 / (hidden_size ** 0.5)
    sz = 1.0 / (code_size ** 0.5)
    u = lambda kk, shape, bound: jax.random.uniform(
        kk, shape, jnp.float32, -bound, bound)
    return {
        "w_ih": u(k[0], (4 * hidden_size, input_size), s),   # weight_ih_l0
        "w_hh": u(k[1], (4 * hidden_size, hidden_size), s),  # weight_hh_l0
        "b_ih": u(k[2], (4 * hidden_size,), s),
        "b_hh": u(k[3], (4 * hidden_size,), s),
        "wz": u(k[4], (2 * hidden_size, code_size), sz),     # fcz.weight
        "bz": u(k[5], (2 * hidden_size,), sz),               # fcz.bias
    }


if __name__ == "__main__":
    B, T, INPUT, HIDDEN, CODE = 2, 8, 16, 32, 8

    key = jax.random.PRNGKey(0)
    k_in, k_z, k_p = jax.random.split(key, 3)
    inputs = jax.random.normal(k_in, (B, T, INPUT), jnp.float32)
    z = jax.random.normal(k_z, (1, B, CODE), jnp.float32)
    params = make_params(k_p, INPUT, HIDDEN, CODE)

    outputs, (h_n, c_n) = decoder_forward(inputs, z, params)
    jax.block_until_ready((outputs, h_n, c_n))

    ref_out, (ref_h, ref_c) = _reference_forward(inputs, z, params)
    assert outputs.shape == (B, T, HIDDEN)
    assert h_n.shape == (1, B, HIDDEN) and c_n.shape == (1, B, HIDDEN)
    # bf16 matmul operands (f32 accumulation) vs the pure-f32 reference ->
    # small, bounded drift; tolerance reflects that.
    assert jnp.allclose(outputs, ref_out, atol=5e-2, rtol=5e-2)
    assert jnp.allclose(h_n, ref_h, atol=5e-2, rtol=5e-2)
    assert jnp.allclose(c_n, ref_c, atol=5e-2, rtol=5e-2)

    print("KERNEL_OK")
</pallas_src>

<mosaic_0001>
module attributes {stable_mosaic.version = 11 : i64} {
  func.func @_decoder_lstm_kernel(%arg0: i32, %arg1: i32, %arg2: memref<8x2x16xbf16, #tpu.memory_space<vmem>>, %arg3: memref<16x512xbf16, #tpu.memory_space<vmem>>, %arg4: memref<128x512xbf16, #tpu.memory_space<vmem>>, %arg5: memref<1x512xf32, #tpu.memory_space<vmem>>, %arg6: memref<2x8xf32, #tpu.memory_space<vmem>>, %arg7: memref<8x256xf32, #tpu.memory_space<vmem>>, %arg8: memref<1x256xf32, #tpu.memory_space<vmem>>, %arg9: memref<2x1024xf32, #tpu.memory_space<vmem>>, %arg10: memref<2x128xf32, #tpu.memory_space<vmem>>, %arg11: memref<2x128xf32, #tpu.memory_space<vmem>>, %arg12: memref<2x128xf32, #tpu.memory_space<vmem>>, %arg13: memref<2x128xf32, #tpu.memory_space<vmem>>) attributes {dimension_semantics = [#tpu.dimension_semantics<parallel>, #tpu.dimension_semantics<arbitrary>], iteration_bounds = array<i64: 1, 1>, scalar_prefetch = 0 : i64, scratch_operands = 2 : i64, tpu.core_type = #tpu.core_type<tc>, window_params = [{transform_indices = @transform_0, window_bounds = array<i64: 8, 2, 16>}, {pipeline_mode = #tpu.pipeline_mode<synchronous>, transform_indices = @transform_1, window_bounds = array<i64: 16, 512>}, {pipeline_mode = #tpu.pipeline_mode<synchronous>, transform_indices = @transform_2, window_bounds = array<i64: 128, 512>}, {pipeline_mode = #tpu.pipeline_mode<synchronous>, transform_indices = @transform_3, window_bounds = array<i64: 1, 512>}, {transform_indices = @transform_4, window_bounds = array<i64: 2, 8>}, {pipeline_mode = #tpu.pipeline_mode<synchronous>, transform_indices = @transform_5, window_bounds = array<i64: 8, 256>}, {pipeline_mode = #tpu.pipeline_mode<synchronous>, transform_indices = @transform_6, window_bounds = array<i64: 1, 256>}, {transform_indices = @transform_7, window_bounds = array<i64: 2, 1024>}, {transform_indices = @transform_8, window_bounds = array<i64: 2, 128>}, {transform_indices = @transform_9, window_bounds = array<i64: 2, 128>}]} {
    %c0_i32 = arith.constant 0 : i32
    %0 = arith.cmpi eq, %arg1, %c0_i32 : i32
    %1 = arith.extui %0 : i1 to i32
    %c0_i32_0 = arith.constant 0 : i32
    %2 = arith.cmpi ne, %1, %c0_i32_0 : i32
    scf.if %2 {
      %c0_127 = arith.constant 0 : index
      %c0_128 = arith.constant 0 : index
      %267 = vector.load %arg6[%c0_127, %c0_128] : memref<2x8xf32, #tpu.memory_space<vmem>>, vector<2x8xf32>
      %c0_129 = arith.constant 0 : index
      %c0_130 = arith.constant 0 : index
      %268 = vector.load %arg7[%c0_129, %c0_130] : memref<8x256xf32, #tpu.memory_space<vmem>>, vector<8x256xf32>
      %cst_131 = arith.constant dense<0.000000e+00> : vector<2x256xf32>
      %269 = tpu.matmul %267, %268, %cst_131 {dimension_numbers = #tpu.dot_dimension_numbers<[1], [0], [0], [1], [0, 0, 1, 1], [], []>} : vector<2x8xf32>, vector<8x256xf32>, vector<2x256xf32> -> vector<2x256xf32>
      %c0_132 = arith.constant 0 : index
      %c0_133 = arith.constant 0 : index
      %270 = vector.load %arg8[%c0_132, %c0_133] : memref<1x256xf32, #tpu.memory_space<vmem>>, vector<1x256xf32>
      %271 = vector.broadcast %270 : vector<1x256xf32> to vector<2x256xf32>
      %272 = arith.addf %269, %271 : vector<2x256xf32>
      %273 = math.tanh %272 : vector<2x256xf32>
      %274 = vector.extract_strided_slice %273 {offsets = [0, 0], sizes = [2, 128], strides = [1, 1]} : vector<2x256xf32> to vector<2x128xf32>
      %c0_134 = arith.constant 0 : index
      %c0_135 = arith.constant 0 : index
      %275 = vector.load %arg12[%c0_134, %c0_135] : memref<2x128xf32, #tpu.memory_space<vmem>>, vector<2x128xf32>
      tpu.vector_store %arg12[%c0_134, %c0_135], %274 {strides = array<i32>} : memref<2x128xf32, #tpu.memory_space<vmem>>, vector<2x128xf32>,
      %276 = vector.extract_strided_slice %273 {offsets = [0, 128], sizes = [2, 128], strides = [1, 1]} : vector<2x256xf32> to vector<2x128xf32>
      %c0_136 = arith.constant 0 : index
      %c0_137 = arith.constant 0 : index
      %277 = vector.load %arg13[%c0_136, %c0_137] : memref<2x128xf32, #tpu.memory_space<vmem>>, vector<2x128xf32>
      tpu.vector_store %arg13[%c0_136, %c0_137], %276 {strides = array<i32>} : memref<2x128xf32, #tpu.memory_space<vmem>>, vector<2x128xf32>,
    } else {
    }
    %c0 = arith.constant 0 : index
    %c0_1 = arith.constant 0 : index
    %3 = vector.load %arg3[%c0, %c0_1] : memref<16x512xbf16, #tpu.memory_space<vmem>>, vector<16x512xbf16>
    %c0_2 = arith.constant 0 : index
    %c0_3 = arith.constant 0 : index
    %4 = vector.load %arg4[%c0_2, %c0_3] : memref<128x512xbf16, #tpu.memory_space<vmem>>, vector<128x512xbf16>
    %c0_4 = arith.constant 0 : index
    %c0_5 = arith.constant 0 : index
    %5 = vector.load %arg5[%c0_4, %c0_5] : memref<1x512xf32, #tpu.memory_space<vmem>>, vector<1x512xf32>
    %6 = vector.shape_cast %5 : vector<1x512xf32> to vector<1x512xf32>
    %7 = vector.broadcast %6 : vector<1x512xf32> to vector<2x512xf32>
    %c0_i32_6 = arith.constant 0 : i32
    %8 = arith.index_cast %c0_i32_6 : i32 to index
    %c0_7 = arith.constant 0 : index
    %c0_8 = arith.constant 0 : index
    %9 = vector.load %arg2[%8, %c0_7, %c0_8] : memref<8x2x16xbf16, #tpu.memory_space<vmem>>, vector<1x2x16xbf16>
    %10 = vector.shape_cast %9 : vector<1x2x16xbf16> to vector<2x16xbf16>
    %c0_9 = arith.constant 0 : index
    %c0_10 = arith.constant 0 : index
    %11 = vector.load %arg12[%c0_9, %c0_10] : memref<2x128xf32, #tpu.memory_space<vmem>>, vector<2x128xf32>
    %cst = arith.constant dense<0.000000e+00> : vector<2x512xf32>
    %12 = tpu.matmul %10, %3, %cst {dimension_numbers = #tpu.dot_dimension_numbers<[1], [0], [0], [1], [0, 0, 1, 1], [], []>} : vector<2x16xbf16>, vector<16x512xbf16>, vector<2x512xf32> -> vector<2x512xf32>
    %13 = arith.truncf %11 : vector<2x128xf32> to vector<2x128xbf16>
    %cst_11 = arith.constant dense<0.000000e+00> : vector<2x512xf32>
    %14 = tpu.matmul %13, %4, %cst_11 {dimension_numbers = #tpu.dot_dimension_numbers<[1], [0], [0], [1], [0, 0, 1, 1], [], []>} : vector<2x128xbf16>, vector<128x512xbf16>, vector<2x512xf32> -> vector<2x512xf32>
    %15 = arith.addf %12, %14 : vector<2x512xf32>
    %16 = arith.addf %15, %7 : vector<2x512xf32>
    %17 = vector.extract_strided_slice %16 {offsets = [0, 0], sizes = [2, 384], strides = [1, 1]} : vector<2x512xf32> to vector<2x384xf32>
    %18 = arith.negf %17 : vector<2x384xf32>
    %19 = math.exp %18 : vector<2x384xf32>
    %cst_12 = arith.constant 1.000000e+00 : f32
    %20 = vector.broadcast %cst_12 : f32 to vector<2x384xf32>
    %21 = arith.addf %20, %19 : vector<2x384xf32>
    %22 = arith.divf %20, %21 : vector<2x384xf32>
    %23 = vector.extract_strided_slice %16 {offsets = [0, 384], sizes = [2, 128], strides = [1, 1]} : vector<2x512xf32> to vector<2x128xf32>
    %24 = math.tanh %23 : vector<2x128xf32>
    %25 = vector.extract_strided_slice %22 {offsets = [0, 0], sizes = [2, 128], strides = [1, 1]} : vector<2x384xf32> to vector<2x128xf32>
    %26 = vector.extract_strided_slice %22 {offsets = [0, 128], sizes = [2, 128], strides = [1, 1]} : vector<2x384xf32> to vector<2x128xf32>
    %27 = vector.extract_strided_slice %22 {offsets = [0, 256], sizes = [2, 128], strides = [1, 1]} : vector<2x384xf32> to vector<2x128xf32>
    %c0_13 = arith.constant 0 : index
    %c0_14 = arith.constant 0 : index
    %28 = vector.load %arg13[%c0_13, %c0_14] : memref<2x128xf32, #tpu.memory_space<vmem>>, vector<2x128xf32>
    %29 = arith.mulf %26, %28 : vector<2x128xf32>
    %30 = arith.mulf %25, %24 : vector<2x128xf32>
    %31 = arith.addf %29, %30 : vector<2x128xf32>
    %32 = math.tanh %31 : vector<2x128xf32>
    %33 = arith.mulf %27, %32 : vector<2x128xf32>
    %c0_15 = arith.constant 0 : index
    %c0_16 = arith.constant 0 : index
    %34 = vector.load %arg13[%c0_15, %c0_16] : memref<2x128xf32, #tpu.memory_space<vmem>>, vector<2x128xf32>
    tpu.vector_store %arg13[%c0_15, %c0_16], %31 {strides = array<i32>} : memref<2x128xf32, #tpu.memory_space<vmem>>, vector<2x128xf32>,
    %c0_17 = arith.constant 0 : index
    %c0_18 = arith.constant 0 : index
    %35 = vector.load %arg12[%c0_17, %c0_18] : memref<2x128xf32, #tpu.memory_space<vmem>>, vector<2x128xf32>
    tpu.vector_store %arg12[%c0_17, %c0_18], %33 {strides = array<i32>} : memref<2x128xf32, #tpu.memory_space<vmem>>, vector<2x128xf32>,
    %c128_i32 = arith.constant 128 : i32
    %36 = arith.muli %c0_i32_6, %c128_i32 : i32
    %37 = tpu.assume_multiple %36, 128 : i32
    %c0_19 = arith.constant 0 : index
    %38 = arith.index_cast %37 : i32 to index
    %39 = vector.load %arg9[%c0_19, %38] : memref<2x1024xf32, #tpu.memory_space<vmem>>, vector<2x128xf32>
    tpu.vector_store %arg9[%c0_19, %38], %33 {strides = array<i32>} : memref<2x1024xf32, #tpu.memory_space<vmem>>, vector<2x128xf32>,
    %c1_i32 = arith.constant 1 : i32
    %40 = arith.index_cast %c1_i32 : i32 to index
    %c0_20 = arith.constant 0 : index
    %c0_21 = arith.constant 0 : index
    %41 = vector.load %arg2[%40, %c0_20, %c0_21] : memref<8x2x16xbf16, #tpu.memory_space<vmem>>, vector<1x2x16xbf16>
    %42 = vector.shape_cast %41 : vector<1x2x16xbf16> to vector<2x16xbf16>
    %c0_22 = arith.constant 0 : index
    %c0_23 = arith.constant 0 : index
    %43 = vector.load %arg12[%c0_22, %c0_23] : memref<2x128xf32, #tpu.memory_space<vmem>>, vector<2x128xf32>
    %cst_24 = arith.constant dense<0.000000e+00> : vector<2x512xf32>
    %44 = tpu.matmul %42, %3, %cst_24 {dimension_numbers = #tpu.dot_dimension_numbers<[1], [0], [0], [1], [0, 0, 1, 1], [], []>} : vector<2x16xbf16>, vector<16x512xbf16>, vector<2x512xf32> -> vector<2x512xf32>
    %45 = arith.truncf %43 : vector<2x128xf32> to vector<2x128xbf16>
    %cst_25 = arith.constant dense<0.000000e+00> : vector<2x512xf32>
    %46 = tpu.matmul %45, %4, %cst_25 {dimension_numbers = #tpu.dot_dimension_numbers<[1], [0], [0], [1], [0, 0, 1, 1], [], []>} : vector<2x128xbf16>, vector<128x512xbf16>, vector<2x512xf32> -> vector<2x512xf32>
    %47 = arith.addf %44, %46 : vector<2x512xf32>
    %48 = arith.addf %47, %7 : vector<2x512xf32>
    %49 = vector.extract_strided_slice %48 {offsets = [0, 0], sizes = [2, 384], strides = [1, 1]} : vector<2x512xf32> to vector<2x384xf32>
    %50 = arith.negf %49 : vector<2x384xf32>
    %51 = math.exp %50 : vector<2x384xf32>
    %cst_26 = arith.constant 1.000000e+00 : f32
    %52 = vector.broadcast %cst_26 : f32 to vector<2x384xf32>
    %53 = arith.addf %52, %51 : vector<2x384xf32>
    %54 = arith.divf %52, %53 : vector<2x384xf32>
    %55 = vector.extract_strided_slice %48 {offsets = [0, 384], sizes = [2, 128], strides = [1, 1]} : vector<2x512xf32> to vector<2x128xf32>
    %56 = math.tanh %55 : vector<2x128xf32>
    %57 = vector.extract_strided_slice %54 {offsets = [0, 0], sizes = [2, 128], strides = [1, 1]} : vector<2x384xf32> to vector<2x128xf32>
    %58 = vector.extract_strided_slice %54 {offsets = [0, 128], sizes = [2, 128], strides = [1, 1]} : vector<2x384xf32> to vector<2x128xf32>
    %59 = vector.extract_strided_slice %54 {offsets = [0, 256], sizes = [2, 128], strides = [1, 1]} : vector<2x384xf32> to vector<2x128xf32>
    %c0_27 = arith.constant 0 : index
    %c0_28 = arith.constant 0 : index
    %60 = vector.load %arg13[%c0_27, %c0_28] : memref<2x128xf32, #tpu.memory_space<vmem>>, vector<2x128xf32>
    %61 = arith.mulf %58, %60 : vector<2x128xf32>
    %62 = arith.mulf %57, %56 : vector<2x128xf32>
    %63 = arith.addf %61, %62 : vector<2x128xf32>
    %64 = math.tanh %63 : vector<2x128xf32>
    %65 = arith.mulf %59, %64 : vector<2x128xf32>
    %c0_29 = arith.constant 0 : index
    %c0_30 = arith.constant 0 : index
    %66 = vector.load %arg13[%c0_29, %c0_30] : memref<2x128xf32, #tpu.memory_space<vmem>>, vector<2x128xf32>
    tpu.vector_store %arg13[%c0_29, %c0_30], %63 {strides = array<i32>} : memref<2x128xf32, #tpu.memory_space<vmem>>, vector<2x128xf32>,
    %c0_31 = arith.constant 0 : index
    %c0_32 = arith.constant 0 : index
    %67 = vector.load %arg12[%c0_31, %c0_32] : memref<2x128xf32, #tpu.memory_space<vmem>>, vector<2x128xf32>
    tpu.vector_store %arg12[%c0_31, %c0_32], %65 {strides = array<i32>} : memref<2x128xf32, #tpu.memory_space<vmem>>, vector<2x128xf32>,
    %c128_i32_33 = arith.constant 128 : i32
    %68 = arith.muli %c1_i32, %c128_i32_33 : i32
    %69 = tpu.assume_multiple %68, 128 : i32
    %c0_34 = arith.constant 0 : index
    %70 = arith.index_cast %69 : i32 to index
    %71 = vector.load %arg9[%c0_34, %70] : memref<2x1024xf32, #tpu.memory_space<vmem>>, vector<2x128xf32>
    tpu.vector_store %arg9[%c0_34, %70], %65 {strides = array<i32>} : memref<2x1024xf32, #tpu.memory_space<vmem>>, vector<2x128xf32>,
    %c2_i32 = arith.constant 2 : i32
    %72 = arith.index_cast %c2_i32 : i32 to index
    %c0_35 = arith.constant 0 : index
    %c0_36 = arith.constant 0 : index
    %73 = vector.load %arg2[%72, %c0_35, %c0_36] : memref<8x2x16xbf16, #tpu.memory_space<vmem>>, vector<1x2x16xbf16>
    %74 = vector.shape_cast %73 : vector<1x2x16xbf16> to vector<2x16xbf16>
    %c0_37 = arith.constant 0 : index
    %c0_38 = arith.constant 0 : index
    %75 = vector.load %arg12[%c0_37, %c0_38] : memref<2x128xf32, #tpu.memory_space<vmem>>, vector<2x128xf32>
    %cst_39 = arith.constant dense<0.000000e+00> : vector<2x512xf32>
    %76 = tpu.matmul %74, %3, %cst_39 {dimension_numbers = #tpu.dot_dimension_numbers<[1], [0], [0], [1], [0, 0, 1, 1], [], []>} : vector<2x16xbf16>, vector<16x512xbf16>, vector<2x512xf32> -> vector<2x512xf32>
    %77 = arith.truncf %75 : vector<2x128xf32> to vector<2x128xbf16>
    %cst_40 = arith.constant dense<0.000000e+00> : vector<2x512xf32>
    %78 = tpu.matmul %77, %4, %cst_40 {dimension_numbers = #tpu.dot_dimension_numbers<[1], [0], [0], [1], [0, 0, 1, 1], [], []>} : vector<2x128xbf16>, vector<128x512xbf16>, vector<2x512xf32> -> vector<2x512xf32>
    %79 = arith.addf %76, %78 : vector<2x512xf32>
    %80 = arith.addf %79, %7 : vector<2x512xf32>
    %81 = vector.extract_strided_slice %80 {offsets = [0, 0], sizes = [2, 384], strides = [1, 1]} : vector<2x512xf32> to vector<2x384xf32>
    %82 = arith.negf %81 : vector<2x384xf32>
    %83 = math.exp %82 : vector<2x384xf32>
    %cst_41 = arith.constant 1.000000e+00 : f32
    %84 = vector.broadcast %cst_41 : f32 to vector<2x384xf32>
    %85 = arith.addf %84, %83 : vector<2x384xf32>
    %86 = arith.divf %84, %85 : vector<2x384xf32>
    %87 = vector.extract_strided_slice %80 {offsets = [0, 384], sizes = [2, 128], strides = [1, 1]} : vector<2x512xf32> to vector<2x128xf32>
    %88 = math.tanh %87 : vector<2x128xf32>
    %89 = vector.extract_strided_slice %86 {offsets = [0, 0], sizes = [2, 128], strides = [1, 1]} : vector<2x384xf32> to vector<2x128xf32>
    %90 = vector.extract_strided_slice %86 {offsets = [0, 128], sizes = [2, 128], strides = [1, 1]} : vector<2x384xf32> to vector<2x128xf32>
    %91 = vector.extract_strided_slice %86 {offsets = [0, 256], sizes = [2, 128], strides = [1, 1]} : vector<2x384xf32> to vector<2x128xf32>
    %c0_42 = arith.constant 0 : index
    %c0_43 = arith.constant 0 : index
    %92 = vector.load %arg13[%c0_42, %c0_43] : memref<2x128xf32, #tpu.memory_space<vmem>>, vector<2x128xf32>
    %93 = arith.mulf %90, %92 : vector<2x128xf32>
    %94 = arith.mulf %89, %88 : vector<2x128xf32>
    %95 = arith.addf %93, %94 : vector<2x128xf32>
    %96 = math.tanh %95 : vector<2x128xf32>
    %97 = arith.mulf %91, %96 : vector<2x128xf32>
    %c0_44 = arith.constant 0 : index
    %c0_45 = arith.constant 0 : index
    %98 = vector.load %arg13[%c0_44, %c0_45] : memref<2x128xf32, #tpu.memory_space<vmem>>, vector<2x128xf32>
    tpu.vector_store %arg13[%c0_44, %c0_45], %95 {strides = array<i32>} : memref<2x128xf32, #tpu.memory_space<vmem>>, vector<2x128xf32>,
    %c0_46 = arith.constant 0 : index
    %c0_47 = arith.constant 0 : index
    %99 = vector.load %arg12[%c0_46, %c0_47] : memref<2x128xf32, #tpu.memory_space<vmem>>, vector<2x128xf32>
    tpu.vector_store %arg12[%c0_46, %c0_47], %97 {strides = array<i32>} : memref<2x128xf32, #tpu.memory_space<vmem>>, vector<2x128xf32>,
    %c128_i32_48 = arith.constant 128 : i32
    %100 = arith.muli %c2_i32, %c128_i32_48 : i32
    %101 = tpu.assume_multiple %100, 128 : i32
    %c0_49 = arith.constant 0 : index
    %102 = arith.index_cast %101 : i32 to index
    %103 = vector.load %arg9[%c0_49, %102] : memref<2x1024xf32, #tpu.memory_space<vmem>>, vector<2x128xf32>
    tpu.vector_store %arg9[%c0_49, %102], %97 {strides = array<i32>} : memref<2x1024xf32, #tpu.memory_space<vmem>>, vector<2x128xf32>,
    %c3_i32 = arith.constant 3 : i32
    %104 = arith.index_cast %c3_i32 : i32 to index
    %c0_50 = arith.constant 0 : index
    %c0_51 = arith.constant 0 : index
    %105 = vector.load %arg2[%104, %c0_50, %c0_51] : memref<8x2x16xbf16, #tpu.memory_space<vmem>>, vector<1x2x16xbf16>
    %106 = vector.shape_cast %105 : vector<1x2x16xbf16> to vector<2x16xbf16>
    %c0_52 = arith.constant 0 : index
    %c0_53 = arith.constant 0 : index
    %107 = vector.load %arg12[%c0_52, %c0_53] : memref<2x128xf32, #tpu.memory_space<vmem>>, vector<2x128xf32>
    %cst_54 = arith.constant dense<0.000000e+00> : vector<2x512xf32>
    %108 = tpu.matmul %106, %3, %cst_54 {dimension_numbers = #tpu.dot_dimension_numbers<[1], [0], [0], [1], [0, 0, 1, 1], [], []>} : vector<2x16xbf16>, vector<16x512xbf16>, vector<2x512xf32> -> vector<2x512xf32>
    %109 = arith.truncf %107 : vector<2x128xf32> to vector<2x128xbf16>
    %cst_55 = arith.constant dense<0.000000e+00> : vector<2x512xf32>
    %110 = tpu.matmul %109, %4, %cst_55 {dimension_numbers = #tpu.dot_dimension_numbers<[1], [0], [0], [1], [0, 0, 1, 1], [], []>} : vector<2x128xbf16>, vector<128x512xbf16>, vector<2x512xf32> -> vector<2x512xf32>
    %111 = arith.addf %108, %110 : vector<2x512xf32>
    %112 = arith.addf %111, %7 : vector<2x512xf32>
    %113 = vector.extract_strided_slice %112 {offsets = [0, 0], sizes = [2, 384], strides = [1, 1]} : vector<2x512xf32> to vector<2x384xf32>
    %114 = arith.negf %113 : vector<2x384xf32>
    %115 = math.exp %114 : vector<2x384xf32>
    %cst_56 = arith.constant 1.000000e+00 : f32
    %116 = vector.broadcast %cst_56 : f32 to vector<2x384xf32>
    %117 = arith.addf %116, %115 : vector<2x384xf32>
    %118 = arith.divf %116, %117 : vector<2x384xf32>
    %119 = vector.extract_strided_slice %112 {offsets = [0, 384], sizes = [2, 128], strides = [1, 1]} : vector<2x512xf32> to vector<2x128xf32>
    %120 = math.tanh %119 : vector<2x128xf32>
    %121 = vector.extract_strided_slice %118 {offsets = [0, 0], sizes = [2, 128], strides = [1, 1]} : vector<2x384xf32> to vector<2x128xf32>
    %122 = vector.extract_strided_slice %118 {offsets = [0, 128], sizes = [2, 128], strides = [1, 1]} : vector<2x384xf32> to vector<2x128xf32>
    %123 = vector.extract_strided_slice %118 {offsets = [0, 256], sizes = [2, 128], strides = [1, 1]} : vector<2x384xf32> to vector<2x128xf32>
    %c0_57 = arith.constant 0 : index
    %c0_58 = arith.constant 0 : index
    %124 = vector.load %arg13[%c0_57, %c0_58] : memref<2x128xf32, #tpu.memory_space<vmem>>, vector<2x128xf32>
    %125 = arith.mulf %122, %124 : vector<2x128xf32>
    %126 = arith.mulf %121, %120 : vector<2x128xf32>
    %127 = arith.addf %125, %126 : vector<2x128xf32>
    %128 = math.tanh %127 : vector<2x128xf32>
    %129 = arith.mulf %123, %128 : vector<2x128xf32>
    %c0_59 = arith.constant 0 : index
    %c0_60 = arith.constant 0 : index
    %130 = vector.load %arg13[%c0_59, %c0_60] : memref<2x128xf32, #tpu.memory_space<vmem>>, vector<2x128xf32>
    tpu.vector_store %arg13[%c0_59, %c0_60], %127 {strides = array<i32>} : memref<2x128xf32, #tpu.memory_space<vmem>>, vector<2x128xf32>,
    %c0_61 = arith.constant 0 : index
    %c0_62 = arith.constant 0 : index
    %131 = vector.load %arg12[%c0_61, %c0_62] : memref<2x128xf32, #tpu.memory_space<vmem>>, vector<2x128xf32>
    tpu.vector_store %arg12[%c0_61, %c0_62], %129 {strides = array<i32>} : memref<2x128xf32, #tpu.memory_space<vmem>>, vector<2x128xf32>,
    %c128_i32_63 = arith.constant 128 : i32
    %132 = arith.muli %c3_i32, %c128_i32_63 : i32
    %133 = tpu.assume_multiple %132, 128 : i32
    %c0_64 = arith.constant 0 : index
    %134 = arith.index_cast %133 : i32 to index
    %135 = vector.load %arg9[%c0_64, %134] : memref<2x1024xf32, #tpu.memory_space<vmem>>, vector<2x128xf32>
    tpu.vector_store %arg9[%c0_64, %134], %129 {strides = array<i32>} : memref<2x1024xf32, #tpu.memory_space<vmem>>, vector<2x128xf32>,
    %c4_i32 = arith.constant 4 : i32
    %136 = arith.index_cast %c4_i32 : i32 to index
    %c0_65 = arith.constant 0 : index
    %c0_66 = arith.constant 0 : index
    %137 = vector.load %arg2[%136, %c0_65, %c0_66] : memref<8x2x16xbf16, #tpu.memory_space<vmem>>, vector<1x2x16xbf16>
    %138 = vector.shape_cast %137 : vector<1x2x16xbf16> to vector<2x16xbf16>
    %c0_67 = arith.constant 0 : index
    %c0_68 = arith.constant 0 : index
    %139 = vector.load %arg12[%c0_67, %c0_68] : memref<2x128xf32, #tpu.memory_space<vmem>>, vector<2x128xf32>
    %cst_69 = arith.constant dense<0.000000e+00> : vector<2x512xf32>
    %140 = tpu.matmul %138, %3, %cst_69 {dimension_numbers = #tpu.dot_dimension_numbers<[1], [0], [0], [1], [0, 0, 1, 1], [], []>} : vector<2x16xbf16>, vector<16x512xbf16>, vector<2x512xf32> -> vector<2x512xf32>
    %141 = arith.truncf %139 : vector<2x128xf32> to vector<2x128xbf16>
    %cst_70 = arith.constant dense<0.000000e+00> : vector<2x512xf32>
    %142 = tpu.matmul %141, %4, %cst_70 {dimension_numbers = #tpu.dot_dimension_numbers<[1], [0], [0], [1], [0, 0, 1, 1], [], []>} : vector<2x128xbf16>, vector<128x512xbf16>, vector<2x512xf32> -> vector<2x512xf32>
    %143 = arith.addf %140, %142 : vector<2x512xf32>
    %144 = arith.addf %143, %7 : vector<2x512xf32>
    %145 = vector.extract_strided_slice %144 {offsets = [0, 0], sizes = [2, 384], strides = [1, 1]} : vector<2x512xf32> to vector<2x384xf32>
    %146 = arith.negf %145 : vector<2x384xf32>
    %147 = math.exp %146 : vector<2x384xf32>
    %cst_71 = arith.constant 1.000000e+00 : f32
    %148 = vector.broadcast %cst_71 : f32 to vector<2x384xf32>
    %149 = arith.addf %148, %147 : vector<2x384xf32>
    %150 = arith.divf %148, %149 : vector<2x384xf32>
    %151 = vector.extract_strided_slice %144 {offsets = [0, 384], sizes = [2, 128], strides = [1, 1]} : vector<2x512xf32> to vector<2x128xf32>
    %152 = math.tanh %151 : vector<2x128xf32>
    %153 = vector.extract_strided_slice %150 {offsets = [0, 0], sizes = [2, 128], strides = [1, 1]} : vector<2x384xf32> to vector<2x128xf32>
    %154 = vector.extract_strided_slice %150 {offsets = [0, 128], sizes = [2, 128], strides = [1, 1]} : vector<2x384xf32> to vector<2x128xf32>
    %155 = vector.extract_strided_slice %150 {offsets = [0, 256], sizes = [2, 128], strides = [1, 1]} : vector<2x384xf32> to vector<2x128xf32>
    %c0_72 = arith.constant 0 : index
    %c0_73 = arith.constant 0 : index
    %156 = vector.load %arg13[%c0_72, %c0_73] : memref<2x128xf32, #tpu.memory_space<vmem>>, vector<2x128xf32>
    %157 = arith.mulf %154, %156 : vector<2x128xf32>
    %158 = arith.mulf %153, %152 : vector<2x128xf32>
    %159 = arith.addf %157, %158 : vector<2x128xf32>
    %160 = math.tanh %159 : vector<2x128xf32>
    %161 = arith.mulf %155, %160 : vector<2x128xf32>
    %c0_74 = arith.constant 0 : index
    %c0_75 = arith.constant 0 : index
    %162 = vector.load %arg13[%c0_74, %c0_75] : memref<2x128xf32, #tpu.memory_space<vmem>>, vector<2x128xf32>
    tpu.vector_store %arg13[%c0_74, %c0_75], %159 {strides = array<i32>} : memref<2x128xf32, #tpu.memory_space<vmem>>, vector<2x128xf32>,
    %c0_76 = arith.constant 0 : index
    %c0_77 = arith.constant 0 : index
    %163 = vector.load %arg12[%c0_76, %c0_77] : memref<2x128xf32, #tpu.memory_space<vmem>>, vector<2x128xf32>
    tpu.vector_store %arg12[%c0_76, %c0_77], %161 {strides = array<i32>} : memref<2x128xf32, #tpu.memory_space<vmem>>, vector<2x128xf32>,
    %c128_i32_78 = arith.constant 128 : i32
    %164 = arith.muli %c4_i32, %c128_i32_78 : i32
    %165 = tpu.assume_multiple %164, 128 : i32
    %c0_79 = arith.constant 0 : index
    %166 = arith.index_cast %165 : i32 to index
    %167 = vector.load %arg9[%c0_79, %166] : memref<2x1024xf32, #tpu.memory_space<vmem>>, vector<2x128xf32>
    tpu.vector_store %arg9[%c0_79, %166], %161 {strides = array<i32>} : memref<2x1024xf32, #tpu.memory_space<vmem>>, vector<2x128xf32>,
    %c5_i32 = arith.constant 5 : i32
    %168 = arith.index_cast %c5_i32 : i32 to index
    %c0_80 = arith.constant 0 : index
    %c0_81 = arith.constant 0 : index
    %169 = vector.load %arg2[%168, %c0_80, %c0_81] : memref<8x2x16xbf16, #tpu.memory_space<vmem>>, vector<1x2x16xbf16>
    %170 = vector.shape_cast %169 : vector<1x2x16xbf16> to vector<2x16xbf16>
    %c0_82 = arith.constant 0 : index
    %c0_83 = arith.constant 0 : index
    %171 = vector.load %arg12[%c0_82, %c0_83] : memref<2x128xf32, #tpu.memory_space<vmem>>, vector<2x128xf32>
    %cst_84 = arith.constant dense<0.000000e+00> : vector<2x512xf32>
    %172 = tpu.matmul %170, %3, %cst_84 {dimension_numbers = #tpu.dot_dimension_numbers<[1], [0], [0], [1], [0, 0, 1, 1], [], []>} : vector<2x16xbf16>, vector<16x512xbf16>, vector<2x512xf32> -> vector<2x512xf32>
    %173 = arith.truncf %171 : vector<2x128xf32> to vector<2x128xbf16>
    %cst_85 = arith.constant dense<0.000000e+00> : vector<2x512xf32>
    %174 = tpu.matmul %173, %4, %cst_85 {dimension_numbers = #tpu.dot_dimension_numbers<[1], [0], [0], [1], [0, 0, 1, 1], [], []>} : vector<2x128xbf16>, vector<128x512xbf16>, vector<2x512xf32> -> vector<2x512xf32>
    %175 = arith.addf %172, %174 : vector<2x512xf32>
    %176 = arith.addf %175, %7 : vector<2x512xf32>
    %177 = vector.extract_strided_slice %176 {offsets = [0, 0], sizes = [2, 384], strides = [1, 1]} : vector<2x512xf32> to vector<2x384xf32>
    %178 = arith.negf %177 : vector<2x384xf32>
    %179 = math.exp %178 : vector<2x384xf32>
    %cst_86 = arith.constant 1.000000e+00 : f32
    %180 = vector.broadcast %cst_86 : f32 to vector<2x384xf32>
    %181 = arith.addf %180, %179 : vector<2x384xf32>
    %182 = arith.divf %180, %181 : vector<2x384xf32>
    %183 = vector.extract_strided_slice %176 {offsets = [0, 384], sizes = [2, 128], strides = [1, 1]} : vector<2x512xf32> to vector<2x128xf32>
    %184 = math.tanh %183 : vector<2x128xf32>
    %185 = vector.extract_strided_slice %182 {offsets = [0, 0], sizes = [2, 128], strides = [1, 1]} : vector<2x384xf32> to vector<2x128xf32>
    %186 = vector.extract_strided_slice %182 {offsets = [0, 128], sizes = [2, 128], strides = [1, 1]} : vector<2x384xf32> to vector<2x128xf32>
    %187 = vector.extract_strided_slice %182 {offsets = [0, 256], sizes = [2, 128], strides = [1, 1]} : vector<2x384xf32> to vector<2x128xf32>
    %c0_87 = arith.constant 0 : index
    %c0_88 = arith.constant 0 : index
    %188 = vector.load %arg13[%c0_87, %c0_88] : memref<2x128xf32, #tpu.memory_space<vmem>>, vector<2x128xf32>
    %189 = arith.mulf %186, %188 : vector<2x128xf32>
    %190 = arith.mulf %185, %184 : vector<2x128xf32>
    %191 = arith.addf %189, %190 : vector<2x128xf32>
    %192 = math.tanh %191 : vector<2x128xf32>
    %193 = arith.mulf %187, %192 : vector<2x128xf32>
    %c0_89 = arith.constant 0 : index
    %c0_90 = arith.constant 0 : index
    %194 = vector.load %arg13[%c0_89, %c0_90] : memref<2x128xf32, #tpu.memory_space<vmem>>, vector<2x128xf32>
    tpu.vector_store %arg13[%c0_89, %c0_90], %191 {strides = array<i32>} : memref<2x128xf32, #tpu.memory_space<vmem>>, vector<2x128xf32>,
    %c0_91 = arith.constant 0 : index
    %c0_92 = arith.constant 0 : index
    %195 = vector.load %arg12[%c0_91, %c0_92] : memref<2x128xf32, #tpu.memory_space<vmem>>, vector<2x128xf32>
    tpu.vector_store %arg12[%c0_91, %c0_92], %193 {strides = array<i32>} : memref<2x128xf32, #tpu.memory_space<vmem>>, vector<2x128xf32>,
    %c128_i32_93 = arith.constant 128 : i32
    %196 = arith.muli %c5_i32, %c128_i32_93 : i32
    %197 = tpu.assume_multiple %196, 128 : i32
    %c0_94 = arith.constant 0 : index
    %198 = arith.index_cast %197 : i32 to index
    %199 = vector.load %arg9[%c0_94, %198] : memref<2x1024xf32, #tpu.memory_space<vmem>>, vector<2x128xf32>
    tpu.vector_store %arg9[%c0_94, %198], %193 {strides = array<i32>} : memref<2x1024xf32, #tpu.memory_space<vmem>>, vector<2x128xf32>,
    %c6_i32 = arith.constant 6 : i32
    %200 = arith.index_cast %c6_i32 : i32 to index
    %c0_95 = arith.constant 0 : index
    %c0_96 = arith.constant 0 : index
    %201 = vector.load %arg2[%200, %c0_95, %c0_96] : memref<8x2x16xbf16, #tpu.memory_space<vmem>>, vector<1x2x16xbf16>
    %202 = vector.shape_cast %201 : vector<1x2x16xbf16> to vector<2x16xbf16>
    %c0_97 = arith.constant 0 : index
    %c0_98 = arith.constant 0 : index
    %203 = vector.load %arg12[%c0_97, %c0_98] : memref<2x128xf32, #tpu.memory_space<vmem>>, vector<2x128xf32>
    %cst_99 = arith.constant dense<0.000000e+00> : vector<2x512xf32>
    %204 = tpu.matmul %202, %3, %cst_99 {dimension_numbers = #tpu.dot_dimension_numbers<[1], [0], [0], [1], [0, 0, 1, 1], [], []>} : vector<2x16xbf16>, vector<16x512xbf16>, vector<2x512xf32> -> vector<2x512xf32>
    %205 = arith.truncf %203 : vector<2x128xf32> to vector<2x128xbf16>
    %cst_100 = arith.constant dense<0.000000e+00> : vector<2x512xf32>
    %206 = tpu.matmul %205, %4, %cst_100 {dimension_numbers = #tpu.dot_dimension_numbers<[1], [0], [0], [1], [0, 0, 1, 1], [], []>} : vector<2x128xbf16>, vector<128x512xbf16>, vector<2x512xf32> -> vector<2x512xf32>
    %207 = arith.addf %204, %206 : vector<2x512xf32>
    %208 = arith.addf %207, %7 : vector<2x512xf32>
    %209 = vector.extract_strided_slice %208 {offsets = [0, 0], sizes = [2, 384], strides = [1, 1]} : vector<2x512xf32> to vector<2x384xf32>
    %210 = arith.negf %209 : vector<2x384xf32>
    %211 = math.exp %210 : vector<2x384xf32>
    %cst_101 = arith.constant 1.000000e+00 : f32
    %212 = vector.broadcast %cst_101 : f32 to vector<2x384xf32>
    %213 = arith.addf %212, %211 : vector<2x384xf32>
    %214 = arith.divf %212, %213 : vector<2x384xf32>
    %215 = vector.extract_strided_slice %208 {offsets = [0, 384], sizes = [2, 128], strides = [1, 1]} : vector<2x512xf32> to vector<2x128xf32>
    %216 = math.tanh %215 : vector<2x128xf32>
    %217 = vector.extract_strided_slice %214 {offsets = [0, 0], sizes = [2, 128], strides = [1, 1]} : vector<2x384xf32> to vector<2x128xf32>
    %218 = vector.extract_strided_slice %214 {offsets = [0, 128], sizes = [2, 128], strides = [1, 1]} : vector<2x384xf32> to vector<2x128xf32>
    %219 = vector.extract_strided_slice %214 {offsets = [0, 256], sizes = [2, 128], strides = [1, 1]} : vector<2x384xf32> to vector<2x128xf32>
    %c0_102 = arith.constant 0 : index
    %c0_103 = arith.constant 0 : index
    %220 = vector.load %arg13[%c0_102, %c0_103] : memref<2x128xf32, #tpu.memory_space<vmem>>, vector<2x128xf32>
    %221 = arith.mulf %218, %220 : vector<2x128xf32>
    %222 = arith.mulf %217, %216 : vector<2x128xf32>
    %223 = arith.addf %221, %222 : vector<2x128xf32>
    %224 = math.tanh %223 : vector<2x128xf32>
    %225 = arith.mulf %219, %224 : vector<2x128xf32>
    %c0_104 = arith.constant 0 : index
    %c0_105 = arith.constant 0 : index
    %226 = vector.load %arg13[%c0_104, %c0_105] : memref<2x128xf32, #tpu.memory_space<vmem>>, vector<2x128xf32>
    tpu.vector_store %arg13[%c0_104, %c0_105], %223 {strides = array<i32>} : memref<2x128xf32, #tpu.memory_space<vmem>>, vector<2x128xf32>,
    %c0_106 = arith.constant 0 : index
    %c0_107 = arith.constant 0 : index
    %227 = vector.load %arg12[%c0_106, %c0_107] : memref<2x128xf32, #tpu.memory_space<vmem>>, vector<2x128xf32>
    tpu.vector_store %arg12[%c0_106, %c0_107], %225 {strides = array<i32>} : memref<2x128xf32, #tpu.memory_space<vmem>>, vector<2x128xf32>,
    %c128_i32_108 = arith.constant 128 : i32
    %228 = arith.muli %c6_i32, %c128_i32_108 : i32
    %229 = tpu.assume_multiple %228, 128 : i32
    %c0_109 = arith.constant 0 : index
    %230 = arith.index_cast %229 : i32 to index
    %231 = vector.load %arg9[%c0_109, %230] : memref<2x1024xf32, #tpu.memory_space<vmem>>, vector<2x128xf32>
    tpu.vector_store %arg9[%c0_109, %230], %225 {strides = array<i32>} : memref<2x1024xf32, #tpu.memory_space<vmem>>, vector<2x128xf32>,
    %c7_i32 = arith.constant 7 : i32
    %232 = arith.index_cast %c7_i32 : i32 to index
    %c0_110 = arith.constant 0 : index
    %c0_111 = arith.constant 0 : index
    %233 = vector.load %arg2[%232, %c0_110, %c0_111] : memref<8x2x16xbf16, #tpu.memory_space<vmem>>, vector<1x2x16xbf16>
    %234 = vector.shape_cast %233 : vector<1x2x16xbf16> to vector<2x16xbf16>
    %c0_112 = arith.constant 0 : index
    %c0_113 = arith.constant 0 : index
    %235 = vector.load %arg12[%c0_112, %c0_113] : memref<2x128xf32, #tpu.memory_space<vmem>>, vector<2x128xf32>
    %cst_114 = arith.constant dense<0.000000e+00> : vector<2x512xf32>
    %236 = tpu.matmul %234, %3, %cst_114 {dimension_numbers = #tpu.dot_dimension_numbers<[1], [0], [0], [1], [0, 0, 1, 1], [], []>} : vector<2x16xbf16>, vector<16x512xbf16>, vector<2x512xf32> -> vector<2x512xf32>
    %237 = arith.truncf %235 : vector<2x128xf32> to vector<2x128xbf16>
    %cst_115 = arith.constant dense<0.000000e+00> : vector<2x512xf32>
    %238 = tpu.matmul %237, %4, %cst_115 {dimension_numbers = #tpu.dot_dimension_numbers<[1], [0], [0], [1], [0, 0, 1, 1], [], []>} : vector<2x128xbf16>, vector<128x512xbf16>, vector<2x512xf32> -> vector<2x512xf32>
    %239 = arith.addf %236, %238 : vector<2x512xf32>
    %240 = arith.addf %239, %7 : vector<2x512xf32>
    %241 = vector.extract_strided_slice %240 {offsets = [0, 0], sizes = [2, 384], strides = [1, 1]} : vector<2x512xf32> to vector<2x384xf32>
    %242 = arith.negf %241 : vector<2x384xf32>
    %243 = math.exp %242 : vector<2x384xf32>
    %cst_116 = arith.constant 1.000000e+00 : f32
    %244 = vector.broadcast %cst_116 : f32 to vector<2x384xf32>
    %245 = arith.addf %244, %243 : vector<2x384xf32>
    %246 = arith.divf %244, %245 : vector<2x384xf32>
    %247 = vector.extract_strided_slice %240 {offsets = [0, 384], sizes = [2, 128], strides = [1, 1]} : vector<2x512xf32> to vector<2x128xf32>
    %248 = math.tanh %247 : vector<2x128xf32>
    %249 = vector.extract_strided_slice %246 {offsets = [0, 0], sizes = [2, 128], strides = [1, 1]} : vector<2x384xf32> to vector<2x128xf32>
    %250 = vector.extract_strided_slice %246 {offsets = [0, 128], sizes = [2, 128], strides = [1, 1]} : vector<2x384xf32> to vector<2x128xf32>
    %251 = vector.extract_strided_slice %246 {offsets = [0, 256], sizes = [2, 128], strides = [1, 1]} : vector<2x384xf32> to vector<2x128xf32>
    %c0_117 = arith.constant 0 : index
    %c0_118 = arith.constant 0 : index
    %252 = vector.load %arg13[%c0_117, %c0_118] : memref<2x128xf32, #tpu.memory_space<vmem>>, vector<2x128xf32>
    %253 = arith.mulf %250, %252 : vector<2x128xf32>
    %254 = arith.mulf %249, %248 : vector<2x128xf32>
    %255 = arith.addf %253, %254 : vector<2x128xf32>
    %256 = math.tanh %255 : vector<2x128xf32>
    %257 = arith.mulf %251, %256 : vector<2x128xf32>
    %c0_119 = arith.constant 0 : index
    %c0_120 = arith.constant 0 : index
    %258 = vector.load %arg13[%c0_119, %c0_120] : memref<2x128xf32, #tpu.memory_space<vmem>>, vector<2x128xf32>
    tpu.vector_store %arg13[%c0_119, %c0_120], %255 {strides = array<i32>} : memref<2x128xf32, #tpu.memory_space<vmem>>, vector<2x128xf32>,
    %c0_121 = arith.constant 0 : index
    %c0_122 = arith.constant 0 : index
    %259 = vector.load %arg12[%c0_121, %c0_122] : memref<2x128xf32, #tpu.memory_space<vmem>>, vector<2x128xf32>
    tpu.vector_store %arg12[%c0_121, %c0_122], %257 {strides = array<i32>} : memref<2x128xf32, #tpu.memory_space<vmem>>, vector<2x128xf32>,
    %c128_i32_123 = arith.constant 128 : i32
    %260 = arith.muli %c7_i32, %c128_i32_123 : i32
    %261 = tpu.assume_multiple %260, 128 : i32
    %c0_124 = arith.constant 0 : index
    %262 = arith.index_cast %261 : i32 to index
    %263 = vector.load %arg9[%c0_124, %262] : memref<2x1024xf32, #tpu.memory_space<vmem>>, vector<2x128xf32>
    tpu.vector_store %arg9[%c0_124, %262], %257 {strides = array<i32>} : memref<2x1024xf32, #tpu.memory_space<vmem>>, vector<2x128xf32>,
    %c8_i32 = arith.constant 8 : i32
    %c0_i32_125 = arith.constant 0 : i32
    %264 = arith.cmpi eq, %arg1, %c0_i32_125 : i32
    %265 = arith.extui %264 : i1 to i32
    %c0_i32_126 = arith.constant 0 : i32
    %266 = arith.cmpi ne, %265, %c0_i32_126 : i32
    scf.if %266 {
      %c0_127 = arith.constant 0 : index
      %c0_128 = arith.constant 0 : index
      %267 = vector.load %arg12[%c0_127, %c0_128] : memref<2x128xf32, #tpu.memory_space<vmem>>, vector<2x128xf32>
      %c0_129 = arith.constant 0 : index
      %c0_130 = arith.constant 0 : index
      %268 = vector.load %arg10[%c0_129, %c0_130] : memref<2x128xf32, #tpu.memory_space<vmem>>, vector<2x128xf32>
      tpu.vector_store %arg10[%c0_129, %c0_130], %267 {strides = array<i32>} : memref<2x128xf32, #tpu.memory_space<vmem>>, vector<2x128xf32>,
      %c0_131 = arith.constant 0 : index
      %c0_132 = arith.constant 0 : index
      %269 = vector.load %arg13[%c0_131, %c0_132] : memref<2x128xf32, #tpu.memory_space<vmem>>, vector<2x128xf32>
      %c0_133 = arith.constant 0 : index
      %c0_134 = arith.constant 0 : index
      %270 = vector.load %arg11[%c0_133, %c0_134] : memref<2x128xf32, #tpu.memory_space<vmem>>, vector<2x128xf32>
      tpu.vector_store %arg11[%c0_133, %c0_134], %269 {strides = array<i32>} : memref<2x128xf32, #tpu.memory_space<vmem>>, vector<2x128xf32>,
    } else {
    }
    return
  }
  func.func @transform_0(%arg0: i32, %arg1: i32) -> (i32, i32, i32) {
    %c0_i32 = arith.constant 0 : i32
    %c0_i32_0 = arith.constant 0 : i32
    return %arg1, %arg0, %c0_i32 : i32, i32, i32
  }
  func.func @transform_1(%arg0: i32, %arg1: i32) -> (i32, i32) {
    %c0_i32 = arith.constant 0 : i32
    %c0_i32_0 = arith.constant 0 : i32
    %c0_i32_1 = arith.constant 0 : i32
    return %c0_i32, %c0_i32_0 : i32, i32
  }
  func.func @transform_2(%arg0: i32, %arg1: i32) -> (i32, i32) {
    %c0_i32 = arith.constant 0 : i32
    %c0_i32_0 = arith.constant 0 : i32
    %c0_i32_1 = arith.constant 0 : i32
    return %c0_i32, %c0_i32_0 : i32, i32
  }
  func.func @transform_3(%arg0: i32, %arg1: i32) -> (i32, i32) {
    %c0_i32 = arith.constant 0 : i32
    %c0_i32_0 = arith.constant 0 : i32
    %c0_i32_1 = arith.constant 0 : i32
    return %c0_i32, %c0_i32_0 : i32, i32
  }
  func.func @transform_4(%arg0: i32, %arg1: i32) -> (i32, i32) {
    %c0_i32 = arith.constant 0 : i32
    %c0_i32_0 = arith.constant 0 : i32
    return %arg0, %c0_i32 : i32, i32
  }
  func.func @transform_5(%arg0: i32, %arg1: i32) -> (i32, i32) {
    %c0_i32 = arith.constant 0 : i32
    %c0_i32_0 = arith.constant 0 : i32
    %c0_i32_1 = arith.constant 0 : i32
    return %c0_i32, %c0_i32_0 : i32, i32
  }
  func.func @transform_6(%arg0: i32, %arg1: i32) -> (i32, i32) {
    %c0_i32 = arith.constant 0 : i32
    %c0_i32_0 = arith.constant 0 : i32
    %c0_i32_1 = arith.constant 0 : i32
    return %c0_i32, %c0_i32_0 : i32, i32
  }
  func.func @transform_7(%arg0: i32, %arg1: i32) -> (i32, i32) {
    %c0_i32 = arith.constant 0 : i32
    return %arg0, %arg1 : i32, i32
  }
  func.func @transform_8(%arg0: i32, %arg1: i32) -> (i32, i32) {
    %c0_i32 = arith.constant 0 : i32
    %c0_i32_0 = arith.constant 0 : i32
    return %arg0, %c0_i32 : i32, i32
  }
  func.func @transform_9(%arg0: i32, %arg1: i32) -> (i32, i32) {
    %c0_i32 = arith.constant 0 : i32
    %c0_i32_0 = arith.constant 0 : i32
    return %arg0, %c0_i32 : i32, i32
  }
}

</mosaic_0001>

<bundles_post_ra>
// kernel: decoder_forward.1
= control target key start
LH: loop header
LB: loop body
LE: loop exit
PB: predicated region body
PF: predicated region fallthrough
CT: control target
= control target key end

     0   :  { %vm43_vm0 = vcmask 64512   ;;  %vm372_vm1 = vcmask 130048   ;;  %s2950_s5 = inlined_call_operand.vmem [shape: f32[8,256], index: 5, kind: input, shape index: {}]   ;;  %s2951_s4 = inlined_call_operand.vmem [shape: f32[2,8], index: 4, kind: input, shape index: {}]   ;;  %s2952_s2 = inlined_call_operand.vmem [shape: bf16[128,512], index: 2, kind: input, shape index: {}]   ;;  %s2953_s1 = inlined_call_operand.vmem [shape: bf16[16,512], index: 1, kind: input, shape index: {}]   ;;  %s2954_s6 = inlined_call_operand.vmem [shape: f32[1,256], index: 6, kind: input, shape index: {}]   ;;  %s2955_s0 = inlined_call_operand.vmem [shape: bf16[8,2,16], index: 0, kind: input, shape index: {}]   ;;  %s2956_s3 = inlined_call_operand.vmem [shape: f32[1,512], index: 3, kind: input, shape index: {}]   ;;  %s2957_s7 = inlined_call_operand.vmem [shape: f32[2,1024], index: 7, kind: output, shape index: {0}]   ;;  %s2958_s9 = inlined_call_operand.vmem [shape: f32[2,128], index: 9, kind: output, shape index: {2}]   ;;  %s2959_s8 = inlined_call_operand.vmem [shape: f32[2,128], index: 8, kind: output, shape index: {1}]  }
   0x1   :  { %v35_v0 = vld [vmem:[%s2950_s5] sm:$0xff]  ;;  %v36_v2 = vld [vmem:[%s2950_s5 + $0x8] sm:$0xff]  ;;  %v2049_v4 = vld [vmem:[%s2952_s2 + $0xec] sm:$0xf0] }
   0x2   :  { %v34_v1 = vld [vmem:[%s2951_s4] sm:$0x3]  ;;  %62 = vmatpush.msra.mxu0 %v35_v0  ;;  %82 = vmatpush.msra.mxu1 %v36_v2  ;;  %v2047_v5 = vld [vmem:[%s2952_s2 + $0xe4] sm:$0xf]  ;;  %v1917_v7 = vld [vmem:[%s2952_s2 + $0xf0] sm:$0xf0] }
   0x3   :  { %v1915_v3 = vld [vmem:[%s2952_s2 + $0xe0] sm:$0xf]  ;;  %1799 = vmatmul.msk.f32.vlgmr.msra.gmra.mxu0 %vm43_vm0, %v34_v1  ;;  %v1923_v8 = vld [vmem:[%s2952_s2 + $0xe8] sm:$0xf]  ;;  %v2050_v9 = vld [vmem:[%s2952_s2 + $0xf4] sm:$0xf0]  ;;  %1800 = vmatmul.msk.f32.vlgmr.msra.gmra.mxu1 %vm43_vm0, %v34_v1  ;;  %v2262_v10 = vor.u32 %v2047_v5, %v1917_v7 }
   0x4   :  { %v2251_v6 = vor.u32 %v2049_v4, %v1915_v3  ;;  %v2264_v11 = vor.u32 %v2050_v9, %v1923_v8  ;;  %v2048_v12 = vld [vmem:[%s2952_s2 + $0xec] sm:$0xf]  ;;  %v1925_v13 = vld [vmem:[%s2952_s2 + $0xf8] sm:$0xf0]  ;;  %v1899_v14 = vld [vmem:[%s2952_s2 + $0xc0] sm:$0xf] }
   0x5   :  { %v2276_v15 = vor.u32 %v2048_v12, %v1925_v13  ;;  %v2045_v16 = vld [vmem:[%s2952_s2 + $0xcc] sm:$0xf0]  ;;  %v2043_v17 = vld [vmem:[%s2952_s2 + $0xc4] sm:$0xf]  ;;  %v1901_v18 = vld [vmem:[%s2952_s2 + $0xd0] sm:$0xf0]  ;;  %313 = vmatpush.bf16.msra.mxu3 %v2262_v10 }
   0x6   :  { %300 = vmatpush.bf16.msra.mxu2 %v2251_v6  ;;  %326 = vmatpush.bf16.msrb.mxu0 %v2264_v11  ;;  %v2289_v19 = vor.u32 %v2045_v16, %v1899_v14  ;;  %v2291_v20 = vor.u32 %v2043_v17, %v1901_v18  ;;  %v1907_v21 = vld [vmem:[%s2952_s2 + $0xc8] sm:$0xf]  ;;  %v2046_v22 = vld [vmem:[%s2952_s2 + $0xd4] sm:$0xf0]  ;;  %v2044_v23 = vld [vmem:[%s2952_s2 + $0xcc] sm:$0xf] }
   0x7   :  { %339 = vmatpush.bf16.msrb.mxu1 %v2276_v15  ;;  %v2303_v24 = vor.u32 %v2046_v22, %v1907_v21  ;;  %v1909_v25 = vld [vmem:[%s2952_s2 + $0xd8] sm:$0xf0]  ;;  %v1883_v26 = vld [vmem:[%s2952_s2 + $0xa0] sm:$0xf]  ;;  %v2041_v27 = vld [vmem:[%s2952_s2 + $0xac] sm:$0xf0] }
   0x8   :  { %v2314_v28 = vor.u32 %v2044_v23, %v1909_v25  ;;  %v2039_v29 = vld [vmem:[%s2952_s2 + $0xa4] sm:$0xf]  ;;  %v1885_v30 = vld [vmem:[%s2952_s2 + $0xb0] sm:$0xf0]  ;;  %v1891_v31 = vld [vmem:[%s2952_s2 + $0xa8] sm:$0xf]  ;;  %v2326_v32 = vor.u32 %v2041_v27, %v1883_v26 }
   0x9   :  { %v2042_v33 = vld [vmem:[%s2952_s2 + $0xb4] sm:$0xf0]  ;;  %v2040_v34 = vld [vmem:[%s2952_s2 + $0xac] sm:$0xf]  ;;  %v1893_v35 = vld [vmem:[%s2952_s2 + $0xb8] sm:$0xf0]  ;;  %314 = vmatpush.bf16.msra.mxu3 %v2291_v20  ;;  %v2339_v36 = vor.u32 %v2039_v29, %v1885_v30 }
   0xa   :  { %301 = vmatpush.bf16.msra.mxu2 %v2289_v19  ;;  %327 = vmatpush.bf16.msrb.mxu0 %v2303_v24  ;;  %v2341_v37 = vor.u32 %v2042_v33, %v1891_v31  ;;  %v2344_v38 = vor.u32 %v2040_v34, %v1893_v35  ;;  %v1867_v39 = vld [vmem:[%s2952_s2 + $0x80] sm:$0xf]  ;;  %v2037_v40 = vld [vmem:[%s2952_s2 + $0x8c] sm:$0xf0]  ;;  %v2035_v41 = vld [vmem:[%s2952_s2 + $0x84] sm:$0xf] }
   0xb   :  { %340 = vmatpush.bf16.msrb.mxu1 %v2314_v28  ;;  %v2359_v42 = vor.u32 %v2037_v40, %v1867_v39  ;;  %v1869_v43 = vld [vmem:[%s2952_s2 + $0x90] sm:$0xf0]  ;;  %v1875_v44 = vld [vmem:[%s2952_s2 + $0x88] sm:$0xf]  ;;  %v2038_v45 = vld [vmem:[%s2952_s2 + $0x94] sm:$0xf0] }
   0xc   :  { %v2370_v46 = vor.u32 %v2035_v41, %v1869_v43  ;;  %v2372_v47 = vor.u32 %v2038_v45, %v1875_v44  ;;  %v2036_v48 = vld [vmem:[%s2952_s2 + $0x8c] sm:$0xf]  ;;  %v1877_v49 = vld [vmem:[%s2952_s2 + $0x98] sm:$0xf0]  ;;  %v1851_v51 = vld [vmem:[%s2952_s2 + $0x60] sm:$0xf] }
   0xd   :  { %315 = vmatpush.bf16.msra.mxu3 %v2339_v36  ;;  %v2381_v50 = vor.u32 %v2036_v48, %v1877_v49  ;;  %v2033_v52 = vld [vmem:[%s2952_s2 + $0x6c] sm:$0xf0]  ;;  %v2031_v53 = vld [vmem:[%s2952_s2 + $0x64] sm:$0xf]  ;;  %v1853_v55 = vld [vmem:[%s2952_s2 + $0x70] sm:$0xf0] }
   0xe   :  { %302 = vmatpush.bf16.msra.mxu2 %v2326_v32  ;;  %328 = vmatpush.bf16.msrb.mxu0 %v2341_v37  ;;  %v2395_v54 = vor.u32 %v2033_v52, %v1851_v51  ;;  %v1859_v56 = vld [vmem:[%s2952_s2 + $0x68] sm:$0xf]  ;;  %v2034_v57 = vld [vmem:[%s2952_s2 + $0x74] sm:$0xf0]  ;;  %v2406_v58 = vor.u32 %v2031_v53, %v1853_v55  ;;  %v2032_v60 = vld [vmem:[%s2952_s2 + $0x6c] sm:$0xf] }
   0xf   :  { %341 = vmatpush.bf16.msrb.mxu1 %v2344_v38  ;;  %v2408_v59 = vor.u32 %v2034_v57, %v1859_v56  ;;  %v1861_v61 = vld [vmem:[%s2952_s2 + $0x78] sm:$0xf0]  ;;  %v1835_v63 = vld [vmem:[%s2952_s2 + $0x40] sm:$0xf]  ;;  %v2029_v0 = vld [vmem:[%s2952_s2 + $0x4c] sm:$0xf0] }
  0x10   :  { %v2417_v62 = vor.u32 %v2032_v60, %v1861_v61  ;;  %v2027_v1 = vld [vmem:[%s2952_s2 + $0x44] sm:$0xf]  ;;  %v2431_v2 = vor.u32 %v2029_v0, %v1835_v63  ;;  %v1837_v3 = vld [vmem:[%s2952_s2 + $0x50] sm:$0xf0]  ;;  %v1843_v4 = vld [vmem:[%s2952_s2 + $0x48] sm:$0xf] }
  0x11   :  { %316 = vmatpush.bf16.msra.mxu3 %v2370_v46  ;;  %v2030_v5 = vld [vmem:[%s2952_s2 + $0x54] sm:$0xf0]  ;;  %v2442_v7 = vor.u32 %v2027_v1, %v1837_v3  ;;  %v2028_v9 = vld [vmem:[%s2952_s2 + $0x4c] sm:$0xf]  ;;  %v1845_v12 = vld [vmem:[%s2952_s2 + $0x58] sm:$0xf0] }
  0x12   :  { %303 = vmatpush.bf16.msra.mxu2 %v2359_v42  ;;  %329 = vmatpush.bf16.msrb.mxu0 %v2372_v47  ;;  %v2444_v8 = vor.u32 %v2030_v5, %v1843_v4  ;;  %v2453_v13 = vor.u32 %v2028_v9, %v1845_v12  ;;  %v1819_v14 = vld [vmem:[%s2952_s2 + $0x20] sm:$0xf]  ;;  %v2025_v16 = vld [vmem:[%s2952_s2 + $0x2c] sm:$0xf0]  ;;  %v2023_v17 = vld [vmem:[%s2952_s2 + $0x24] sm:$0xf] }
  0x13   :  { %342 = vmatpush.bf16.msrb.mxu1 %v2381_v50  ;;  %v2467_v18 = vor.u32 %v2025_v16, %v1819_v14  ;;  %v1821_v21 = vld [vmem:[%s2952_s2 + $0x30] sm:$0xf0]  ;;  %v1827_v22 = vld [vmem:[%s2952_s2 + $0x28] sm:$0xf]  ;;  %v2026_v23 = vld [vmem:[%s2952_s2 + $0x34] sm:$0xf0] }
  0x14   :  { %v2478_v25 = vor.u32 %v2023_v17, %v1821_v21  ;;  %v2480_v26 = vor.u32 %v2026_v23, %v1827_v22  ;;  %v2024_v27 = vld [vmem:[%s2952_s2 + $0x2c] sm:$0xf]  ;;  %v1829_v29 = vld [vmem:[%s2952_s2 + $0x38] sm:$0xf0]  ;;  %v1803_v30 = vld [vmem:[%s2952_s2] sm:$0xf] }
  0x15   :  { %317 = vmatpush.bf16.msra.mxu3 %v2406_v58  ;;  %v2492_v31 = vor.u32 %v2024_v27, %v1829_v29  ;;  %v2021_v33 = vld [vmem:[%s2952_s2 + $0xc] sm:$0xf0]  ;;  %v2019_v34 = vld [vmem:[%s2952_s2 + $0x4] sm:$0xf]  ;;  %v1805_v35 = vld [vmem:[%s2952_s2 + $0x10] sm:$0xf0] }
  0x16   :  { %304 = vmatpush.bf16.msra.mxu2 %v2395_v54  ;;  %330 = vmatpush.bf16.msrb.mxu0 %v2408_v59  ;;  %v2505_v39 = vor.u32 %v2021_v33, %v1803_v30  ;;  %v2507_v40 = vor.u32 %v2019_v34, %v1805_v35  ;;  %v1811_v41 = vld [vmem:[%s2952_s2 + $0x8] sm:$0xf]  ;;  %v2022_v43 = vld [vmem:[%s2952_s2 + $0x14] sm:$0xf0]  ;;  %v2020_v44 = vld [vmem:[%s2952_s2 + $0xc] sm:$0xf] }
  0x17   :  { %343 = vmatpush.bf16.msrb.mxu1 %v2417_v62  ;;  %v2519_v45 = vor.u32 %v2022_v43, %v1811_v41  ;;  %v1813_v48 = vld [vmem:[%s2952_s2 + $0x18] sm:$0xf0]  ;;  %v1931_v51 = vld [vmem:[%s2953_s1] sm:$0xf]  ;;  %v2017_v52 = vld [vmem:[%s2953_s1 + $0xc] sm:$0xf0] }
  0x18   :  { %v2524_v49 = vor.u32 %v2020_v44, %v1813_v48  ;;  %v2015_v53 = vld [vmem:[%s2953_s1 + $0x4] sm:$0xf]  ;;  %v2539_v55 = vor.u32 %v2017_v52, %v1931_v51  ;;  %v1933_v56 = vld [vmem:[%s2953_s1 + $0x10] sm:$0xf0]  ;;  %v1939_v57 = vld [vmem:[%s2953_s1 + $0x8] sm:$0xf] }
  0x19   :  { %318 = vmatpush.bf16.msra.mxu3 %v2442_v7  ;;  %v2018_v60 = vld [vmem:[%s2953_s1 + $0x14] sm:$0xf0]  ;;  %v2550_v61 = vor.u32 %v2015_v53, %v1933_v56  ;;  %v2016_v0 = vld [vmem:[%s2953_s1 + $0xc] sm:$0xf]  ;;  %v1941_v1 = vld [vmem:[%s2953_s1 + $0x18] sm:$0xf0] }
  0x1a   :  { %305 = vmatpush.bf16.msra.mxu2 %v2431_v2  ;;  %331 = vmatpush.bf16.msrb.mxu0 %v2444_v8  ;;  %v2552_v63 = vor.u32 %v2018_v60, %v1939_v57  ;;  %v2561_v3 = vor.u32 %v2016_v0, %v1941_v1  ;;  %v37_v4 = vld [vmem:[%s2954_s6] sm:$0x3] }
  0x1b   :  { %344 = vmatpush.bf16.msrb.mxu1 %v2453_v13  ;;  %v39_v5 = vperm.slane %v37_v4, 0  ;;  %v40_v14 = vperm.slane %v37_v4, 1  ;;  %v137_v29 = vld [vmem:[%s2955_s0] sm:$0x1] }
  0x1c   :  { %v127_v44 = vld [vmem:[%s2956_s3] sm:$0xf] }
  0x1d   :  { %319 = vmatpush.bf16.msra.mxu3 %v2478_v25  ;;  %v2615_v52 = vperm.slane %v127_v44, 2  ;;  %v2618_v0 = vperm.slane %v127_v44, 0  ;;  %v2620_v1 = vperm.slane %v127_v44, 1 }
  0x1e   :  { %306 = vmatpush.bf16.msra.mxu2 %v2467_v18  ;;  %332 = vmatpush.bf16.msrb.mxu0 %v2480_v26 }
  0x1f   :  { %345 = vmatpush.bf16.msrb.mxu1 %v2492_v31  ;;  %2966 = vst [vmem:[#allocation4_spill] sm:$0xff] %v2618_v0 }
  0x20   :  { %2967 = vst [vmem:[#allocation5_spill] sm:$0xff] %v2620_v1 }
  0x21   :  { %320 = vmatpush.bf16.msra.mxu3 %v2507_v40 }
  0x22   :  { %307 = vmatpush.bf16.msra.mxu2 %v2505_v39  ;;  %333 = vmatpush.bf16.msrb.mxu0 %v2519_v45 }
  0x23   :  { %346 = vmatpush.bf16.msrb.mxu1 %v2524_v49 }
  0x25   :  { %396 = vmatpush.bf16.msrb.mxu3 %v2550_v61 }
  0x26   :  { %383 = vmatpush.bf16.msrb.mxu2 %v2539_v55  ;;  %409 = vmatpush.bf16.msra.mxu0 %v2552_v63 }
  0x27   :  { %422 = vmatpush.bf16.msra.mxu1 %v2561_v3 }
  0x80   :  { %v64_v9 = vpop.f32.mrf.mxu0  ;;  %v84_v16 = vpop.f32.mrf.mxu1 }
  0x81   :  { %v65_v12 = vadd.f32 %v64_v9, %v39_v5  ;;  %v85_v17 = vadd.f32 %v84_v16, %v40_v14 }
  0x83   :  { %2051 = vtanh.f32 %v65_v12 }
  0x84   :  { %2053 = vtanh.f32 %v85_v17 }
  0x89   :  { %v2052_v21 = vpop.eup %2051 }
  0x8a   :  { %89 = vst [vmem:[#allocation2] sm:$0x3] %v2052_v21  ;;  %v2054_v22 = vpop.eup %2053 }
  0x8b   :  { %90 = vst [vmem:[#allocation3] sm:$0x3] %v2054_v22 }
  0x91   :  { %v138_v23 = vld [vmem:[#allocation2] sm:$0x3] }
  0x92   :  { %v139_v27 = vpack.c.bf16 %v138_v23, %v138_v23 }
  0x94   :  { %308 = vmatmul.bf16.vlgmr.msra.gmra.mxu2 %v139_v27  ;;  %321 = vmatmul.bf16.vlgmr.msra.gmra.mxu3 %v139_v27 }
  0x95   :  { %334 = vmatmul.bf16.vlgmr.msrb.gmra.mxu0 %v139_v27  ;;  %347 = vmatmul.bf16.vlgmr.msrb.gmra.mxu1 %v139_v27 }
  0x96   :  { %503 = vmatpush.bf16.msra.mxu2 %v2251_v6  ;;  %516 = vmatpush.bf16.msra.mxu3 %v2262_v10 }
  0x97   :  { %529 = vmatpush.bf16.msrb.mxu0 %v2264_v11  ;;  %542 = vmatpush.bf16.msrb.mxu1 %v2276_v15 }
  0x9a   :  { %504 = vmatpush.bf16.msra.mxu2 %v2289_v19  ;;  %517 = vmatpush.bf16.msra.mxu3 %v2291_v20 }
  0x9b   :  { %530 = vmatpush.bf16.msrb.mxu0 %v2303_v24  ;;  %543 = vmatpush.bf16.msrb.mxu1 %v2314_v28 }
  0x9e   :  { %505 = vmatpush.bf16.msra.mxu2 %v2326_v32  ;;  %518 = vmatpush.bf16.msra.mxu3 %v2339_v36 }
  0x9f   :  { %531 = vmatpush.bf16.msrb.mxu0 %v2341_v37  ;;  %544 = vmatpush.bf16.msrb.mxu1 %v2344_v38 }
  0xa2   :  { %506 = vmatpush.bf16.msra.mxu2 %v2359_v42  ;;  %519 = vmatpush.bf16.msra.mxu3 %v2370_v46 }
  0xa3   :  { %532 = vmatpush.bf16.msrb.mxu0 %v2372_v47  ;;  %545 = vmatpush.bf16.msrb.mxu1 %v2381_v50 }
  0xa4   :  { %1945 = vmatmul.msk.bf16.vlgmr.msrb.gmra.mxu2 %vm372_vm1, %v137_v29  ;;  %1946 = vmatmul.msk.bf16.vlgmr.msrb.gmra.mxu3 %vm372_vm1, %v137_v29 }
  0xa5   :  { %1947 = vmatmul.msk.bf16.vlgmr.msra.gmra.mxu0 %vm372_vm1, %v137_v29  ;;  %1948 = vmatmul.msk.bf16.vlgmr.msra.gmra.mxu1 %vm372_vm1, %v137_v29 }
  0xa6   :  { %507 = vmatpush.bf16.msra.mxu2 %v2395_v54  ;;  %520 = vmatpush.bf16.msra.mxu3 %v2406_v58 }
  0xa7   :  { %533 = vmatpush.bf16.msrb.mxu0 %v2408_v59  ;;  %546 = vmatpush.bf16.msrb.mxu1 %v2417_v62 }
  0xaa   :  { %508 = vmatpush.bf16.msra.mxu2 %v2431_v2  ;;  %521 = vmatpush.bf16.msra.mxu3 %v2442_v7 }
  0xab   :  { %534 = vmatpush.bf16.msrb.mxu0 %v2444_v8  ;;  %547 = vmatpush.bf16.msrb.mxu1 %v2453_v13 }
  0xae   :  { %509 = vmatpush.bf16.msra.mxu2 %v2467_v18  ;;  %522 = vmatpush.bf16.msra.mxu3 %v2478_v25 }
  0xaf   :  { %535 = vmatpush.bf16.msrb.mxu0 %v2480_v26  ;;  %548 = vmatpush.bf16.msrb.mxu1 %v2492_v31 }
  0xb2   :  { %510 = vmatpush.bf16.msra.mxu2 %v2505_v39  ;;  %523 = vmatpush.bf16.msra.mxu3 %v2507_v40 }
  0xb3   :  { %536 = vmatpush.bf16.msrb.mxu0 %v2519_v45  ;;  %549 = vmatpush.bf16.msrb.mxu1 %v2524_v49 }
  0xb6   :  { %565 = vmatpush.bf16.msrb.mxu2 %v2539_v55  ;;  %578 = vmatpush.bf16.msrb.mxu3 %v2550_v61 }
  0xb7   :  { %591 = vmatpush.bf16.msra.mxu0 %v2552_v63  ;;  %604 = vmatpush.bf16.msra.mxu1 %v2561_v3 }
 0x112   :  { %v335_v30 = vpop.f32.mrf.mxu0  ;;  %v348_v33 = vpop.f32.mrf.mxu1 }
 0x117   :  { %v309_v34 = vpop.f32.mrf.mxu2  ;;  %v322_v35 = vpop.f32.mrf.mxu3 }
 0x11a   :  { %v337_v41 = vpop.f32.mrf.mxu0  ;;  %v350_v43 = vpop.f32.mrf.mxu1 }
 0x11f   :  { %v311_v48 = vpop.f32.mrf.mxu2  ;;  %v324_v51 = vpop.f32.mrf.mxu3 }
 0x122   :  { %v411_v53 = vpop.f32.mrf.mxu0  ;;  %v424_v56 = vpop.f32.mrf.mxu1 }
 0x123   :  { %v412_v57 = vadd.f32 %v411_v53, %v335_v30 }
 0x125   :  { %v430_v60 = vadd.f32 %v412_v57, %v2615_v52  ;;  %v425_v57 = vadd.f32 %v424_v56, %v348_v33 }
 0x127   :  { %v1951_v4 = vmul.f32 -1.442695, %v430_v60  ;;  %v385_v5 = vpop.f32.mrf.mxu2  ;;  %v398_v9 = vpop.f32.mrf.mxu3 }
 0x128   :  { %v386_v12 = vadd.f32 %v385_v5, %v309_v34  ;;  %v399_v14 = vadd.f32 %v398_v9, %v322_v35  ;;  %v2624_v35 = vperm.slane %v127_v44, 3 }
 0x129   :  { %2055 = vpow2.f32 %v1951_v4 }
 0x12a   :  { %v428_v16 = vadd.f32 %v386_v12, %v2618_v0  ;;  %v429_v17 = vadd.f32 %v399_v14, %v2620_v1  ;;  %v413_v21 = vpop.f32.mrf.mxu0  ;;  %v426_v22 = vpop.f32.mrf.mxu1  ;;  %2968 = vst [vmem:[#allocation6_spill] sm:$0xff] %v2624_v35  ;;  %v431_v5 = vadd.f32 %v425_v57, %v2624_v35 }
 0x12c   :  { %v1949_v23 = vmul.f32 -1.442695, %v428_v16  ;;  %v1950_v27 = vmul.f32 -1.442695, %v429_v17 }
 0x12e   :  { %2057 = vpow2.f32 %v1949_v23 }
 0x12f   :  { %v2056_v29 = vpop.eup %2055  ;;  %2059 = vpow2.f32 %v1950_v27  ;;  %v387_v30 = vpop.f32.mrf.mxu2 }
 0x130   :  { %v400_v41 = vpop.f32.mrf.mxu3  ;;  %v443_v43 = vadd.f32 1.0, %v2056_v29 }
 0x132   :  { %2061 = vrcp.f32 %v443_v43  ;;  %vm479_vm11 = vweird.f32 %v443_v43 }
 0x134   :  { %v2058_v48 = vpop.eup %2057 }
 0x135   :  { %v2060_v51 = vpop.eup %2059  ;;  %v441_v53 = vadd.f32 1.0, %v2058_v48 }
 0x136   :  { %v442_v34 = vadd.f32 1.0, %v2060_v51 }
 0x137   :  { %2063 = vrcp.f32 %v441_v53  ;;  %v455_v21 = vand.u32 2147483648, %v441_v53  ;;  %v453_v27 = vand.u32 2147483647, %v441_v53  ;;  %vm449_vm4 = vweird.f32 %v441_v53 }
 0x138   :  { %2065 = vrcp.f32 %v442_v34  ;;  %v2062_v60 = vpop.eup %2061  ;;  %v470_v29 = vand.u32 2147483648, %v442_v34  ;;  %v468_v44 = vand.u32 2147483647, %v442_v34  ;;  %vm464_vm6 = vweird.f32 %v442_v34 }
 0x139   :  { %v475_v16 = vmul.f32 %v2062_v60, %v443_v43  ;;  %2067 = vtanh.f32 %v431_v5  ;;  %v456_v41 = vor.u32 1.1754944e-38, %v455_v21  ;;  %vm454_vm7 = vcmp.eq.f32.partialorder %v453_v27, 8.507059e+37 }
 0x13a   :  { %v471_v57 = vor.u32 1.1754944e-38, %v470_v29  ;;  %vm469_vm9 = vcmp.eq.f32.partialorder %v468_v44, 8.507059e+37  ;;  %vm480_vm10 = vweird.f32 %v2062_v60 }
 0x13b   :  { %v476_v33 = vsub.f32 1.0, %v475_v16  ;;  %vm481_vm12 = vmor %vm479_vm11, %vm480_vm10 }
 0x13d   :  { %v2064_v4 = vpop.eup %2063  ;;  %v477_v35 = vmul.f32 %v2062_v60, %v476_v33 }
 0x13e   :  { %v2066_v9 = vpop.eup %2065  ;;  %v445_v12 = vmul.f32 %v2064_v4, %v441_v53  ;;  %vm450_vm2 = vweird.f32 %v2064_v4  ;;  %v485_v53 = vand.u32 2147483648, %v443_v43 }
 0x13f   :  { %v460_v14 = vmul.f32 %v2066_v9, %v442_v34  ;;  %vm465_vm3 = vweird.f32 %v2066_v9  ;;  %vm451_vm5 = vmor %vm449_vm4, %vm450_vm2  ;;  %v2068_v5 = vpop.eup %2067  ;;  %v483_v34 = vand.u32 2147483647, %v443_v43  ;;  %v1952_v43 = vld [vmem:[%s2955_s0 + $0x1] sm:$0x1] }
 0x140   :  { %v446_v17 = vsub.f32 1.0, %v445_v12  ;;  %vm466_vm8 = vmor %vm464_vm6, %vm465_vm3  ;;  %v486_v21 = vor.u32 1.1754944e-38, %v485_v53  ;;  %v2969_v53 = vld [vmem:[#allocation4_spill] sm:$0xff] }
 0x141   :  { %v461_v22 = vsub.f32 1.0, %v460_v14  ;;  %vm484_vm13 = vcmp.eq.f32.partialorder %v483_v34, 8.507059e+37 }
 0x142   :  { %v447_v23 = vmul.f32 %v2064_v4, %v446_v17  ;;  %v490_v17 = vld [vmem:[#allocation3] sm:$0x3] }
 0x143   :  { %v462_v30 = vmul.f32 %v2066_v9, %v461_v22 }
 0x144   :  { %v448_v56 = vadd.f32 %v2064_v4, %v447_v23  ;;  %v478_v23 = vadd.f32 %v2062_v60, %v477_v35 }
 0x145   :  { %v463_v48 = vadd.f32 %v2066_v9, %v462_v30 }
 0x146   :  { %v452_v51 = vsel %vm451_vm5, %v2064_v4, %v448_v56  ;;  %v482_v4 = vsel %vm481_vm12, %v2062_v60, %v478_v23 }
 0x147   :  { %v457_v12 = vsel %vm454_vm7, %v456_v41, %v452_v51  ;;  %v467_v14 = vsel %vm466_vm8, %v2066_v9, %v463_v48  ;;  %v487_v9 = vsel %vm484_vm13, %v486_v21, %v482_v4  ;;  %v2970_v4 = vld [vmem:[#allocation5_spill] sm:$0xff] }
 0x148   :  { %v492_v22 = vmul.f32 %v2068_v5, %v457_v12  ;;  %v472_v1 = vsel %vm469_vm9, %v471_v57, %v467_v14 }
 0x149   :  { %v491_v0 = vmul.f32 %v490_v17, %v472_v1 }
 0x14b   :  { %v493_v16 = vadd.f32 %v492_v22, %v491_v0 }
 0x14d   :  { %2069 = vtanh.f32 %v493_v16  ;;  %496 = vst [vmem:[#allocation3] sm:$0x3] %v493_v16 }
 0x153   :  { %v2070_v27 = vpop.eup %2069 }
 0x154   :  { %v495_v29 = vmul.f32 %v2070_v27, %v487_v9 }
 0x156   :  { %497 = vst [vmem:[#allocation2] sm:$0x3] %v495_v29 }
 0x157   :  { %498 = vst [vmem:[%s2957_s7] sm:$0x3] %v495_v29 }
 0x15d   :  { %v501_v0 = vld [vmem:[#allocation2] sm:$0x3] }
 0x15e   :  { %v502_v1 = vpack.c.bf16 %v501_v0, %v501_v0 }
 0x160   :  { %511 = vmatmul.bf16.vlgmr.msra.gmra.mxu2 %v502_v1  ;;  %524 = vmatmul.bf16.vlgmr.msra.gmra.mxu3 %v502_v1 }
 0x161   :  { %537 = vmatmul.bf16.vlgmr.msrb.gmra.mxu0 %v502_v1  ;;  %550 = vmatmul.bf16.vlgmr.msrb.gmra.mxu1 %v502_v1 }
 0x162   :  { %686 = vmatpush.bf16.msra.mxu2 %v2251_v6  ;;  %699 = vmatpush.bf16.msra.mxu3 %v2262_v10 }
 0x163   :  { %712 = vmatpush.bf16.msrb.mxu0 %v2264_v11  ;;  %725 = vmatpush.bf16.msrb.mxu1 %v2276_v15 }
 0x166   :  { %687 = vmatpush.bf16.msra.mxu2 %v2289_v19  ;;  %700 = vmatpush.bf16.msra.mxu3 %v2291_v20 }
 0x167   :  { %713 = vmatpush.bf16.msrb.mxu0 %v2303_v24  ;;  %726 = vmatpush.bf16.msrb.mxu1 %v2314_v28 }
 0x16a   :  { %688 = vmatpush.bf16.msra.mxu2 %v2326_v32  ;;  %701 = vmatpush.bf16.msra.mxu3 %v2339_v36 }
 0x16b   :  { %714 = vmatpush.bf16.msrb.mxu0 %v2341_v37  ;;  %727 = vmatpush.bf16.msrb.mxu1 %v2344_v38 }
 0x16e   :  { %689 = vmatpush.bf16.msra.mxu2 %v2359_v42  ;;  %702 = vmatpush.bf16.msra.mxu3 %v2370_v46 }
 0x16f   :  { %715 = vmatpush.bf16.msrb.mxu0 %v2372_v47  ;;  %728 = vmatpush.bf16.msrb.mxu1 %v2381_v50 }
 0x170   :  { %1953 = vmatmul.msk.bf16.vlgmr.msrb.gmra.mxu2 %vm372_vm1, %v1952_v43  ;;  %1954 = vmatmul.msk.bf16.vlgmr.msrb.gmra.mxu3 %vm372_vm1, %v1952_v43 }
 0x171   :  { %1955 = vmatmul.msk.bf16.vlgmr.msra.gmra.mxu0 %vm372_vm1, %v1952_v43  ;;  %1956 = vmatmul.msk.bf16.vlgmr.msra.gmra.mxu1 %vm372_vm1, %v1952_v43 }
 0x172   :  { %690 = vmatpush.bf16.msra.mxu2 %v2395_v54  ;;  %703 = vmatpush.bf16.msra.mxu3 %v2406_v58 }
 0x173   :  { %716 = vmatpush.bf16.msrb.mxu0 %v2408_v59  ;;  %729 = vmatpush.bf16.msrb.mxu1 %v2417_v62 }
 0x176   :  { %691 = vmatpush.bf16.msra.mxu2 %v2431_v2  ;;  %704 = vmatpush.bf16.msra.mxu3 %v2442_v7 }
 0x177   :  { %717 = vmatpush.bf16.msrb.mxu0 %v2444_v8  ;;  %730 = vmatpush.bf16.msrb.mxu1 %v2453_v13 }
 0x17a   :  { %692 = vmatpush.bf16.msra.mxu2 %v2467_v18  ;;  %705 = vmatpush.bf16.msra.mxu3 %v2478_v25 }
 0x17b   :  { %718 = vmatpush.bf16.msrb.mxu0 %v2480_v26  ;;  %731 = vmatpush.bf16.msrb.mxu1 %v2492_v31 }
 0x17e   :  { %693 = vmatpush.bf16.msra.mxu2 %v2505_v39  ;;  %706 = vmatpush.bf16.msra.mxu3 %v2507_v40 }
 0x17f   :  { %719 = vmatpush.bf16.msrb.mxu0 %v2519_v45  ;;  %732 = vmatpush.bf16.msrb.mxu1 %v2524_v49 }
 0x182   :  { %748 = vmatpush.bf16.msrb.mxu2 %v2539_v55  ;;  %761 = vmatpush.bf16.msrb.mxu3 %v2550_v61 }
 0x183   :  { %774 = vmatpush.bf16.msra.mxu0 %v2552_v63  ;;  %787 = vmatpush.bf16.msra.mxu1 %v2561_v3 }
 0x1de   :  { %v538_v35 = vpop.f32.mrf.mxu0  ;;  %v551_v60 = vpop.f32.mrf.mxu1 }
 0x1e3   :  { %v512_v30 = vpop.f32.mrf.mxu2  ;;  %v525_v44 = vpop.f32.mrf.mxu3 }
 0x1e6   :  { %v540_v33 = vpop.f32.mrf.mxu0  ;;  %v553_v56 = vpop.f32.mrf.mxu1 }
 0x1eb   :  { %v514_v41 = vpop.f32.mrf.mxu2  ;;  %v527_v48 = vpop.f32.mrf.mxu3 }
 0x1ee   :  { %v593_v51 = vpop.f32.mrf.mxu0  ;;  %v606_v57 = vpop.f32.mrf.mxu1 }
 0x1ef   :  { %v594_v5 = vadd.f32 %v593_v51, %v538_v35 }
 0x1f1   :  { %v612_v12 = vadd.f32 %v594_v5, %v2615_v52 }
 0x1f3   :  { %v1959_v14 = vmul.f32 -1.442695, %v612_v12  ;;  %v567_v17 = vpop.f32.mrf.mxu2  ;;  %v580_v22 = vpop.f32.mrf.mxu3  ;;  %v2971_v12 = vld [vmem:[#allocation6_spill] sm:$0xff] }
 0x1f4   :  { %v568_v16 = vadd.f32 %v567_v17, %v512_v30  ;;  %v581_v23 = vadd.f32 %v580_v22, %v525_v44  ;;  %v607_v44 = vadd.f32 %v606_v57, %v551_v60 }
 0x1f5   :  { %2071 = vpow2.f32 %v1959_v14 }
 0x1f6   :  { %v610_v34 = vadd.f32 %v568_v16, %v2969_v53  ;;  %v611_v21 = vadd.f32 %v581_v23, %v2970_v4  ;;  %v595_v27 = vpop.f32.mrf.mxu0  ;;  %v608_v9 = vpop.f32.mrf.mxu1  ;;  %v613_v14 = vadd.f32 %v607_v44, %v2971_v12  ;;  %v672_v4 = vld [vmem:[#allocation3] sm:$0x3] }
 0x1f8   :  { %v1957_v29 = vmul.f32 -1.442695, %v610_v34  ;;  %v1958_v0 = vmul.f32 -1.442695, %v611_v21 }
 0x1fa   :  { %2073 = vpow2.f32 %v1957_v29 }
 0x1fb   :  { %v2072_v1 = vpop.eup %2071  ;;  %2075 = vpow2.f32 %v1958_v0  ;;  %v569_v43 = vpop.f32.mrf.mxu2 }
 0x1fc   :  { %v582_v35 = vpop.f32.mrf.mxu3  ;;  %v625_v33 = vadd.f32 1.0, %v2072_v1 }
 0x1fe   :  { %2077 = vrcp.f32 %v625_v33  ;;  %vm661_vm8 = vweird.f32 %v625_v33 }
 0x200   :  { %v2074_v56 = vpop.eup %2073 }
 0x201   :  { %v2076_v41 = vpop.eup %2075  ;;  %v623_v48 = vadd.f32 1.0, %v2074_v56 }
 0x202   :  { %v624_v30 = vadd.f32 1.0, %v2076_v41 }
 0x203   :  { %2079 = vrcp.f32 %v623_v48  ;;  %v637_v21 = vand.u32 2147483648, %v623_v48  ;;  %v635_v29 = vand.u32 2147483647, %v623_v48  ;;  %vm631_vm0 = vweird.f32 %v623_v48 }
 0x204   :  { %2081 = vrcp.f32 %v624_v30  ;;  %v2078_v51 = vpop.eup %2077  ;;  %v652_v0 = vand.u32 2147483648, %v624_v30  ;;  %v650_v43 = vand.u32 2147483647, %v624_v30  ;;  %vm646_vm3 = vweird.f32 %v624_v30 }
 0x205   :  { %v657_v23 = vmul.f32 %v2078_v51, %v625_v33  ;;  %2083 = vtanh.f32 %v613_v14  ;;  %v638_v35 = vor.u32 1.1754944e-38, %v637_v21  ;;  %vm636_vm4 = vcmp.eq.f32.partialorder %v635_v29, 8.507059e+37 }
 0x206   :  { %v653_v44 = vor.u32 1.1754944e-38, %v652_v0  ;;  %vm651_vm6 = vcmp.eq.f32.partialorder %v650_v43, 8.507059e+37  ;;  %vm662_vm7 = vweird.f32 %v2078_v51 }
 0x207   :  { %v658_v60 = vsub.f32 1.0, %v657_v23  ;;  %vm663_vm9 = vmor %vm661_vm8, %vm662_vm7 }
 0x209   :  { %v2080_v5 = vpop.eup %2079 }
 0x20a   :  { %v2082_v17 = vpop.eup %2081  ;;  %v627_v22 = vmul.f32 %v2080_v5, %v623_v48  ;;  %vm632_vm14 = vweird.f32 %v2080_v5  ;;  %v667_v48 = vand.u32 2147483648, %v625_v33 }
 0x20b   :  { %v642_v16 = vmul.f32 %v2082_v17, %v624_v30  ;;  %vm647_vm15 = vweird.f32 %v2082_v17  ;;  %vm633_vm2 = vmor %vm631_vm0, %vm632_vm14  ;;  %v2084_v14 = vpop.eup %2083  ;;  %v665_v30 = vand.u32 2147483647, %v625_v33  ;;  %v1961_v33 = vld [vmem:[%s2955_s0 + $0x2] sm:$0x1] }
 0x20c   :  { %v628_v34 = vsub.f32 1.0, %v627_v22  ;;  %vm648_vm5 = vmor %vm646_vm3, %vm647_vm15  ;;  %v668_v21 = vor.u32 1.1754944e-38, %v667_v48  ;;  %v2972_v48 = vld [vmem:[#allocation4_spill] sm:$0xff] }
 0x20d   :  { %v643_v27 = vsub.f32 1.0, %v642_v16  ;;  %vm666_vm10 = vcmp.eq.f32.partialorder %v665_v30, 8.507059e+37 }
 0x20e   :  { %v629_v9 = vmul.f32 %v2080_v5, %v628_v34  ;;  %v659_v34 = vmul.f32 %v2078_v51, %v658_v60 }
 0x20f   :  { %v644_v1 = vmul.f32 %v2082_v17, %v643_v27 }
 0x210   :  { %v630_v57 = vadd.f32 %v2080_v5, %v629_v9  ;;  %v660_v9 = vadd.f32 %v2078_v51, %v659_v34 }
 0x211   :  { %v645_v56 = vadd.f32 %v2082_v17, %v644_v1 }
 0x212   :  { %v634_v41 = vsel %vm633_vm2, %v2080_v5, %v630_v57  ;;  %v664_v5 = vsel %vm663_vm9, %v2078_v51, %v660_v9 }
 0x213   :  { %v639_v22 = vsel %vm636_vm4, %v638_v35, %v634_v41  ;;  %v649_v16 = vsel %vm648_vm5, %v2082_v17, %v645_v56  ;;  %v669_v17 = vsel %vm666_vm10, %v668_v21, %v664_v5  ;;  %v2973_v5 = vld [vmem:[#allocation5_spill] sm:$0xff] }
 0x214   :  { %v674_v12 = vmul.f32 %v2084_v14, %v639_v22  ;;  %v654_v27 = vsel %vm651_vm6, %v653_v44, %v649_v16 }
 0x215   :  { %v673_v53 = vmul.f32 %v672_v4, %v654_v27 }
 0x217   :  { %v675_v23 = vadd.f32 %v674_v12, %v673_v53 }
 0x219   :  { %2085 = vtanh.f32 %v675_v23  ;;  %678 = vst [vmem:[#allocation3] sm:$0x3] %v675_v23 }
 0x21f   :  { %v2086_v29 = vpop.eup %2085 }
 0x220   :  { %v677_v0 = vmul.f32 %v2086_v29, %v669_v17 }
 0x222   :  { %679 = vst [vmem:[#allocation2] sm:$0x3] %v677_v0 }
 0x223   :  { %1960 = vst [vmem:[%s2957_s7 + $0x2] sm:$0x3] %v677_v0 }
 0x229   :  { %v684_v53 = vld [vmem:[#allocation2] sm:$0x3] }
 0x22a   :  { %v685_v4 = vpack.c.bf16 %v684_v53, %v684_v53 }
 0x22c   :  { %694 = vmatmul.bf16.vlgmr.msra.gmra.mxu2 %v685_v4  ;;  %707 = vmatmul.bf16.vlgmr.msra.gmra.mxu3 %v685_v4 }
 0x22d   :  { %720 = vmatmul.bf16.vlgmr.msrb.gmra.mxu0 %v685_v4  ;;  %733 = vmatmul.bf16.vlgmr.msrb.gmra.mxu1 %v685_v4 }
 0x22e   :  { %869 = vmatpush.bf16.msra.mxu2 %v2251_v6  ;;  %882 = vmatpush.bf16.msra.mxu3 %v2262_v10 }
 0x22f   :  { %895 = vmatpush.bf16.msrb.mxu0 %v2264_v11  ;;  %908 = vmatpush.bf16.msrb.mxu1 %v2276_v15 }
 0x232   :  { %870 = vmatpush.bf16.msra.mxu2 %v2289_v19  ;;  %883 = vmatpush.bf16.msra.mxu3 %v2291_v20 }
 0x233   :  { %896 = vmatpush.bf16.msrb.mxu0 %v2303_v24  ;;  %909 = vmatpush.bf16.msrb.mxu1 %v2314_v28 }
 0x236   :  { %871 = vmatpush.bf16.msra.mxu2 %v2326_v32  ;;  %884 = vmatpush.bf16.msra.mxu3 %v2339_v36 }
 0x237   :  { %897 = vmatpush.bf16.msrb.mxu0 %v2341_v37  ;;  %910 = vmatpush.bf16.msrb.mxu1 %v2344_v38 }
 0x23a   :  { %872 = vmatpush.bf16.msra.mxu2 %v2359_v42  ;;  %885 = vmatpush.bf16.msra.mxu3 %v2370_v46 }
 0x23b   :  { %898 = vmatpush.bf16.msrb.mxu0 %v2372_v47  ;;  %911 = vmatpush.bf16.msrb.mxu1 %v2381_v50 }
 0x23c   :  { %1962 = vmatmul.msk.bf16.vlgmr.msrb.gmra.mxu2 %vm372_vm1, %v1961_v33  ;;  %1963 = vmatmul.msk.bf16.vlgmr.msrb.gmra.mxu3 %vm372_vm1, %v1961_v33 }
 0x23d   :  { %1964 = vmatmul.msk.bf16.vlgmr.msra.gmra.mxu0 %vm372_vm1, %v1961_v33  ;;  %1965 = vmatmul.msk.bf16.vlgmr.msra.gmra.mxu1 %vm372_vm1, %v1961_v33 }
 0x23e   :  { %873 = vmatpush.bf16.msra.mxu2 %v2395_v54  ;;  %886 = vmatpush.bf16.msra.mxu3 %v2406_v58 }
 0x23f   :  { %899 = vmatpush.bf16.msrb.mxu0 %v2408_v59  ;;  %912 = vmatpush.bf16.msrb.mxu1 %v2417_v62 }
 0x242   :  { %874 = vmatpush.bf16.msra.mxu2 %v2431_v2  ;;  %887 = vmatpush.bf16.msra.mxu3 %v2442_v7 }
 0x243   :  { %900 = vmatpush.bf16.msrb.mxu0 %v2444_v8  ;;  %913 = vmatpush.bf16.msrb.mxu1 %v2453_v13 }
 0x246   :  { %875 = vmatpush.bf16.msra.mxu2 %v2467_v18  ;;  %888 = vmatpush.bf16.msra.mxu3 %v2478_v25 }
 0x247   :  { %901 = vmatpush.bf16.msrb.mxu0 %v2480_v26  ;;  %914 = vmatpush.bf16.msrb.mxu1 %v2492_v31 }
 0x24a   :  { %876 = vmatpush.bf16.msra.mxu2 %v2505_v39  ;;  %889 = vmatpush.bf16.msra.mxu3 %v2507_v40 }
 0x24b   :  { %902 = vmatpush.bf16.msrb.mxu0 %v2519_v45  ;;  %915 = vmatpush.bf16.msrb.mxu1 %v2524_v49 }
 0x24e   :  { %931 = vmatpush.bf16.msrb.mxu2 %v2539_v55  ;;  %944 = vmatpush.bf16.msrb.mxu3 %v2550_v61 }
 0x24f   :  { %957 = vmatpush.bf16.msra.mxu0 %v2552_v63  ;;  %970 = vmatpush.bf16.msra.mxu1 %v2561_v3 }
 0x2aa   :  { %v721_v51 = vpop.f32.mrf.mxu0  ;;  %v734_v12 = vpop.f32.mrf.mxu1 }
 0x2af   :  { %v695_v1 = vpop.f32.mrf.mxu2  ;;  %v708_v43 = vpop.f32.mrf.mxu3 }
 0x2b2   :  { %v723_v60 = vpop.f32.mrf.mxu0  ;;  %v736_v57 = vpop.f32.mrf.mxu1 }
 0x2b7   :  { %v697_v35 = vpop.f32.mrf.mxu2  ;;  %v710_v56 = vpop.f32.mrf.mxu3 }
 0x2ba   :  { %v776_v41 = vpop.f32.mrf.mxu0  ;;  %v789_v44 = vpop.f32.mrf.mxu1 }
 0x2bb   :  { %v777_v14 = vadd.f32 %v776_v41, %v721_v51 }
 0x2bd   :  { %v795_v22 = vadd.f32 %v777_v14, %v2615_v52 }
 0x2bf   :  { %v1968_v16 = vmul.f32 -1.442695, %v795_v22  ;;  %v750_v34 = vpop.f32.mrf.mxu2  ;;  %v763_v27 = vpop.f32.mrf.mxu3  ;;  %v2974_v22 = vld [vmem:[#allocation6_spill] sm:$0xff] }
 0x2c0   :  { %v751_v23 = vadd.f32 %v750_v34, %v695_v1  ;;  %v764_v9 = vadd.f32 %v763_v27, %v708_v43  ;;  %v790_v43 = vadd.f32 %v789_v44, %v734_v12 }
 0x2c1   :  { %2087 = vpow2.f32 %v1968_v16 }
 0x2c2   :  { %v793_v30 = vadd.f32 %v751_v23, %v2972_v48  ;;  %v794_v21 = vadd.f32 %v764_v9, %v2973_v5  ;;  %v778_v29 = vpop.f32.mrf.mxu0  ;;  %v791_v17 = vpop.f32.mrf.mxu1  ;;  %v796_v16 = vadd.f32 %v790_v43, %v2974_v22  ;;  %v855_v5 = vld [vmem:[#allocation3] sm:$0x3] }
 0x2c4   :  { %v1966_v0 = vmul.f32 -1.442695, %v793_v30  ;;  %v1967_v53 = vmul.f32 -1.442695, %v794_v21 }
 0x2c6   :  { %2089 = vpow2.f32 %v1966_v0 }
 0x2c7   :  { %v2088_v4 = vpop.eup %2087  ;;  %2091 = vpow2.f32 %v1967_v53  ;;  %v752_v33 = vpop.f32.mrf.mxu2 }
 0x2c8   :  { %v765_v51 = vpop.f32.mrf.mxu3  ;;  %v808_v60 = vadd.f32 1.0, %v2088_v4 }
 0x2ca   :  { %2093 = vrcp.f32 %v808_v60  ;;  %vm844_vm5 = vweird.f32 %v808_v60 }
 0x2cc   :  { %v2090_v57 = vpop.eup %2089 }
 0x2cd   :  { %v2092_v35 = vpop.eup %2091  ;;  %v806_v56 = vadd.f32 1.0, %v2090_v57 }
 0x2ce   :  { %v807_v1 = vadd.f32 1.0, %v2092_v35 }
 0x2cf   :  { %2095 = vrcp.f32 %v806_v56  ;;  %v820_v21 = vand.u32 2147483648, %v806_v56  ;;  %v818_v0 = vand.u32 2147483647, %v806_v56  ;;  %vm814_vm13 = vweird.f32 %v806_v56 }
 0x2d0   :  { %2097 = vrcp.f32 %v807_v1  ;;  %v2094_v41 = vpop.eup %2093  ;;  %v835_v53 = vand.u32 2147483648, %v807_v1  ;;  %v833_v33 = vand.u32 2147483647, %v807_v1  ;;  %vm829_vm15 = vweird.f32 %v807_v1 }
 0x2d1   :  { %v840_v9 = vmul.f32 %v2094_v41, %v808_v60  ;;  %2099 = vtanh.f32 %v796_v16  ;;  %v821_v51 = vor.u32 1.1754944e-38, %v820_v21  ;;  %vm819_vm0 = vcmp.eq.f32.partialorder %v818_v0, 8.507059e+37 }
 0x2d2   :  { %v836_v43 = vor.u32 1.1754944e-38, %v835_v53  ;;  %vm834_vm3 = vcmp.eq.f32.partialorder %v833_v33, 8.507059e+37  ;;  %vm845_vm4 = vweird.f32 %v2094_v41 }
 0x2d3   :  { %v841_v12 = vsub.f32 1.0, %v840_v9  ;;  %vm846_vm6 = vmor %vm844_vm5, %vm845_vm4 }
 0x2d5   :  { %v2096_v14 = vpop.eup %2095 }
 0x2d6   :  { %v2098_v34 = vpop.eup %2097  ;;  %v810_v27 = vmul.f32 %v2096_v14, %v806_v56  ;;  %vm815_vm11 = vweird.f32 %v2096_v14  ;;  %v850_v56 = vand.u32 2147483648, %v808_v60 }
 0x2d7   :  { %v825_v23 = vmul.f32 %v2098_v34, %v807_v1  ;;  %vm830_vm12 = vweird.f32 %v2098_v34  ;;  %vm816_vm14 = vmor %vm814_vm13, %vm815_vm11  ;;  %v2100_v16 = vpop.eup %2099  ;;  %v848_v1 = vand.u32 2147483647, %v808_v60  ;;  %v1970_v60 = vld [vmem:[%s2955_s0 + $0x3] sm:$0x1] }
 0x2d8   :  { %v811_v30 = vsub.f32 1.0, %v810_v27  ;;  %vm831_vm2 = vmor %vm829_vm15, %vm830_vm12  ;;  %v851_v21 = vor.u32 1.1754944e-38, %v850_v56  ;;  %v2975_v56 = vld [vmem:[#allocation4_spill] sm:$0xff] }
 0x2d9   :  { %v826_v29 = vsub.f32 1.0, %v825_v23  ;;  %vm849_vm7 = vcmp.eq.f32.partialorder %v848_v1, 8.507059e+37 }
 0x2da   :  { %v812_v17 = vmul.f32 %v2096_v14, %v811_v30  ;;  %v842_v30 = vmul.f32 %v2094_v41, %v841_v12 }
 0x2db   :  { %v827_v4 = vmul.f32 %v2098_v34, %v826_v29 }
 0x2dc   :  { %v813_v44 = vadd.f32 %v2096_v14, %v812_v17  ;;  %v843_v17 = vadd.f32 %v2094_v41, %v842_v30 }
 0x2dd   :  { %v828_v57 = vadd.f32 %v2098_v34, %v827_v4 }
 0x2de   :  { %v817_v35 = vsel %vm816_vm14, %v2096_v14, %v813_v44  ;;  %v847_v14 = vsel %vm846_vm6, %v2094_v41, %v843_v17 }
 0x2df   :  { %v822_v27 = vsel %vm819_vm0, %v821_v51, %v817_v35  ;;  %v832_v23 = vsel %vm831_vm2, %v2098_v34, %v828_v57  ;;  %v852_v34 = vsel %vm849_vm7, %v851_v21, %v847_v14  ;;  %v2976_v14 = vld [vmem:[#allocation5_spill] sm:$0xff] }
 0x2e0   :  { %v857_v22 = vmul.f32 %v2100_v16, %v822_v27  ;;  %v837_v29 = vsel %vm834_vm3, %v836_v43, %v832_v23 }
 0x2e1   :  { %v856_v48 = vmul.f32 %v855_v5, %v837_v29 }
 0x2e3   :  { %v858_v9 = vadd.f32 %v857_v22, %v856_v48 }
 0x2e5   :  { %2101 = vtanh.f32 %v858_v9  ;;  %861 = vst [vmem:[#allocation3] sm:$0x3] %v858_v9 }
 0x2eb   :  { %v2102_v0 = vpop.eup %2101 }
 0x2ec   :  { %v860_v53 = vmul.f32 %v2102_v0, %v852_v34 }
 0x2ee   :  { %862 = vst [vmem:[#allocation2] sm:$0x3] %v860_v53 }
 0x2ef   :  { %1969 = vst [vmem:[%s2957_s7 + $0x4] sm:$0x3] %v860_v53 }
 0x2f5   :  { %v867_v48 = vld [vmem:[#allocation2] sm:$0x3] }
 0x2f6   :  { %v868_v5 = vpack.c.bf16 %v867_v48, %v867_v48 }
 0x2f8   :  { %877 = vmatmul.bf16.vlgmr.msra.gmra.mxu2 %v868_v5  ;;  %890 = vmatmul.bf16.vlgmr.msra.gmra.mxu3 %v868_v5 }
 0x2f9   :  { %903 = vmatmul.bf16.vlgmr.msrb.gmra.mxu0 %v868_v5  ;;  %916 = vmatmul.bf16.vlgmr.msrb.gmra.mxu1 %v868_v5 }
 0x2fa   :  { %1052 = vmatpush.bf16.msra.mxu2 %v2251_v6  ;;  %1065 = vmatpush.bf16.msra.mxu3 %v2262_v10 }
 0x2fb   :  { %1078 = vmatpush.bf16.msrb.mxu0 %v2264_v11  ;;  %1091 = vmatpush.bf16.msrb.mxu1 %v2276_v15 }
 0x2fe   :  { %1053 = vmatpush.bf16.msra.mxu2 %v2289_v19  ;;  %1066 = vmatpush.bf16.msra.mxu3 %v2291_v20 }
 0x2ff   :  { %1079 = vmatpush.bf16.msrb.mxu0 %v2303_v24  ;;  %1092 = vmatpush.bf16.msrb.mxu1 %v2314_v28 }
 0x302   :  { %1054 = vmatpush.bf16.msra.mxu2 %v2326_v32  ;;  %1067 = vmatpush.bf16.msra.mxu3 %v2339_v36 }
 0x303   :  { %1080 = vmatpush.bf16.msrb.mxu0 %v2341_v37  ;;  %1093 = vmatpush.bf16.msrb.mxu1 %v2344_v38 }
 0x306   :  { %1055 = vmatpush.bf16.msra.mxu2 %v2359_v42  ;;  %1068 = vmatpush.bf16.msra.mxu3 %v2370_v46 }
 0x307   :  { %1081 = vmatpush.bf16.msrb.mxu0 %v2372_v47  ;;  %1094 = vmatpush.bf16.msrb.mxu1 %v2381_v50 }
 0x308   :  { %1971 = vmatmul.msk.bf16.vlgmr.msrb.gmra.mxu2 %vm372_vm1, %v1970_v60  ;;  %1972 = vmatmul.msk.bf16.vlgmr.msrb.gmra.mxu3 %vm372_vm1, %v1970_v60 }
 0x309   :  { %1973 = vmatmul.msk.bf16.vlgmr.msra.gmra.mxu0 %vm372_vm1, %v1970_v60  ;;  %1974 = vmatmul.msk.bf16.vlgmr.msra.gmra.mxu1 %vm372_vm1, %v1970_v60 }
 0x30a   :  { %1056 = vmatpush.bf16.msra.mxu2 %v2395_v54  ;;  %1069 = vmatpush.bf16.msra.mxu3 %v2406_v58 }
 0x30b   :  { %1082 = vmatpush.bf16.msrb.mxu0 %v2408_v59  ;;  %1095 = vmatpush.bf16.msrb.mxu1 %v2417_v62 }
 0x30e   :  { %1057 = vmatpush.bf16.msra.mxu2 %v2431_v2  ;;  %1070 = vmatpush.bf16.msra.mxu3 %v2442_v7 }
 0x30f   :  { %1083 = vmatpush.bf16.msrb.mxu0 %v2444_v8  ;;  %1096 = vmatpush.bf16.msrb.mxu1 %v2453_v13 }
 0x312   :  { %1058 = vmatpush.bf16.msra.mxu2 %v2467_v18  ;;  %1071 = vmatpush.bf16.msra.mxu3 %v2478_v25 }
 0x313   :  { %1084 = vmatpush.bf16.msrb.mxu0 %v2480_v26  ;;  %1097 = vmatpush.bf16.msrb.mxu1 %v2492_v31 }
 0x316   :  { %1059 = vmatpush.bf16.msra.mxu2 %v2505_v39  ;;  %1072 = vmatpush.bf16.msra.mxu3 %v2507_v40 }
 0x317   :  { %1085 = vmatpush.bf16.msrb.mxu0 %v2519_v45  ;;  %1098 = vmatpush.bf16.msrb.mxu1 %v2524_v49 }
 0x31a   :  { %1114 = vmatpush.bf16.msrb.mxu2 %v2539_v55  ;;  %1127 = vmatpush.bf16.msrb.mxu3 %v2550_v61 }
 0x31b   :  { %1140 = vmatpush.bf16.msra.mxu0 %v2552_v63  ;;  %1153 = vmatpush.bf16.msra.mxu1 %v2561_v3 }
 0x376   :  { %v904_v41 = vpop.f32.mrf.mxu0  ;;  %v917_v22 = vpop.f32.mrf.mxu1 }
 0x37b   :  { %v878_v4 = vpop.f32.mrf.mxu2  ;;  %v891_v33 = vpop.f32.mrf.mxu3 }
 0x37e   :  { %v906_v12 = vpop.f32.mrf.mxu0  ;;  %v919_v44 = vpop.f32.mrf.mxu1 }
 0x383   :  { %v880_v51 = vpop.f32.mrf.mxu2  ;;  %v893_v57 = vpop.f32.mrf.mxu3 }
 0x386   :  { %v959_v35 = vpop.f32.mrf.mxu0  ;;  %v972_v43 = vpop.f32.mrf.mxu1 }
 0x387   :  { %v960_v16 = vadd.f32 %v959_v35, %v904_v41 }
 0x389   :  { %v978_v27 = vadd.f32 %v960_v16, %v2615_v52 }
 0x38b   :  { %v1977_v23 = vmul.f32 -1.442695, %v978_v27  ;;  %v933_v30 = vpop.f32.mrf.mxu2  ;;  %v946_v29 = vpop.f32.mrf.mxu3  ;;  %v2977_v27 = vld [vmem:[#allocation6_spill] sm:$0xff] }
 0x38c   :  { %v934_v9 = vadd.f32 %v933_v30, %v878_v4  ;;  %v947_v17 = vadd.f32 %v946_v29, %v891_v33  ;;  %v973_v33 = vadd.f32 %v972_v43, %v917_v22 }
 0x38d   :  { %2103 = vpow2.f32 %v1977_v23 }
 0x38e   :  { %v976_v1 = vadd.f32 %v934_v9, %v2975_v56  ;;  %v977_v21 = vadd.f32 %v947_v17, %v2976_v14  ;;  %v961_v0 = vpop.f32.mrf.mxu0  ;;  %v974_v34 = vpop.f32.mrf.mxu1  ;;  %v979_v23 = vadd.f32 %v973_v33, %v2977_v27  ;;  %v1038_v14 = vld [vmem:[#allocation3] sm:$0x3] }
 0x390   :  { %v1975_v53 = vmul.f32 -1.442695, %v976_v1  ;;  %v1976_v48 = vmul.f32 -1.442695, %v977_v21 }
 0x392   :  { %2105 = vpow2.f32 %v1975_v53 }
 0x393   :  { %v2104_v5 = vpop.eup %2103  ;;  %2107 = vpow2.f32 %v1976_v48  ;;  %v935_v60 = vpop.f32.mrf.mxu2 }
 0x394   :  { %v948_v41 = vpop.f32.mrf.mxu3  ;;  %v991_v12 = vadd.f32 1.0, %v2104_v5 }
 0x396   :  { %2109 = vrcp.f32 %v991_v12  ;;  %vm1027_vm2 = vweird.f32 %v991_v12 }
 0x398   :  { %v2106_v44 = vpop.eup %2105 }
 0x399   :  { %v2108_v51 = vpop.eup %2107  ;;  %v989_v57 = vadd.f32 1.0, %v2106_v44 }
 0x39a   :  { %v990_v4 = vadd.f32 1.0, %v2108_v51 }
 0x39b   :  { %2111 = vrcp.f32 %v989_v57  ;;  %v1003_v21 = vand.u32 2147483648, %v989_v57  ;;  %v1001_v53 = vand.u32 2147483647, %v989_v57  ;;  %vm997_vm10 = vweird.f32 %v989_v57 }
 0x39c   :  { %2113 = vrcp.f32 %v990_v4  ;;  %v2110_v35 = vpop.eup %2109  ;;  %v1018_v48 = vand.u32 2147483648, %v990_v4  ;;  %v1016_v60 = vand.u32 2147483647, %v990_v4  ;;  %vm1012_vm12 = vweird.f32 %v990_v4 }
 0x39d   :  { %v1023_v17 = vmul.f32 %v2110_v35, %v991_v12  ;;  %2115 = vtanh.f32 %v979_v23  ;;  %v1004_v41 = vor.u32 1.1754944e-38, %v1003_v21  ;;  %vm1002_vm13 = vcmp.eq.f32.partialorder %v1001_v53, 8.507059e+37 }
 0x39e   :  { %v1019_v33 = vor.u32 1.1754944e-38, %v1018_v48  ;;  %vm1017_vm15 = vcmp.eq.f32.partialorder %v1016_v60, 8.507059e+37  ;;  %vm1028_vm0 = vweird.f32 %v2110_v35 }
 0x39f   :  { %v1024_v22 = vsub.f32 1.0, %v1023_v17  ;;  %vm1029_vm3 = vmor %vm1027_vm2, %vm1028_vm0 }
 0x3a1   :  { %v2112_v16 = vpop.eup %2111 }
 0x3a2   :  { %v2114_v30 = vpop.eup %2113  ;;  %v993_v29 = vmul.f32 %v2112_v16, %v989_v57  ;;  %vm998_vm8 = vweird.f32 %v2112_v16  ;;  %v1033_v57 = vand.u32 2147483648, %v991_v12 }
 0x3a3   :  { %v1008_v9 = vmul.f32 %v2114_v30, %v990_v4  ;;  %vm1013_vm9 = vweird.f32 %v2114_v30  ;;  %vm999_vm11 = vmor %vm997_vm10, %vm998_vm8  ;;  %v2116_v23 = vpop.eup %2115  ;;  %v1031_v4 = vand.u32 2147483647, %v991_v12  ;;  %v1979_v12 = vld [vmem:[%s2955_s0 + $0x4] sm:$0x1] }
 0x3a4   :  { %v994_v1 = vsub.f32 1.0, %v993_v29  ;;  %vm1014_vm14 = vmor %vm1012_vm12, %vm1013_vm9  ;;  %v1034_v21 = vor.u32 1.1754944e-38, %v1033_v57  ;;  %v2978_v57 = vld [vmem:[#allocation4_spill] sm:$0xff] }
 0x3a5   :  { %v1009_v0 = vsub.f32 1.0, %v1008_v9  ;;  %vm1032_vm4 = vcmp.eq.f32.partialorder %v1031_v4, 8.507059e+37 }
 0x3a6   :  { %v995_v34 = vmul.f32 %v2112_v16, %v994_v1  ;;  %v1025_v1 = vmul.f32 %v2110_v35, %v1024_v22 }
 0x3a7   :  { %v1010_v5 = vmul.f32 %v2114_v30, %v1009_v0 }
 0x3a8   :  { %v996_v43 = vadd.f32 %v2112_v16, %v995_v34  ;;  %v1026_v34 = vadd.f32 %v2110_v35, %v1025_v1 }
 0x3a9   :  { %v1011_v44 = vadd.f32 %v2114_v30, %v1010_v5 }
 0x3aa   :  { %v1000_v51 = vsel %vm999_vm11, %v2112_v16, %v996_v43  ;;  %v1030_v16 = vsel %vm1029_vm3, %v2110_v35, %v1026_v34 }
 0x3ab   :  { %v1005_v29 = vsel %vm1002_vm13, %v1004_v41, %v1000_v51  ;;  %v1015_v9 = vsel %vm1014_vm14, %v2114_v30, %v1011_v44  ;;  %v1035_v30 = vsel %vm1032_vm4, %v1034_v21, %v1030_v16  ;;  %v2979_v16 = vld [vmem:[#allocation5_spill] sm:$0xff] }
 0x3ac   :  { %v1040_v27 = vmul.f32 %v2116_v23, %v1005_v29  ;;  %v1020_v0 = vsel %vm1017_vm15, %v1019_v33, %v1015_v9 }
 0x3ad   :  { %v1039_v56 = vmul.f32 %v1038_v14, %v1020_v0 }
 0x3af   :  { %v1041_v17 = vadd.f32 %v1040_v27, %v1039_v56 }
 0x3b1   :  { %2117 = vtanh.f32 %v1041_v17  ;;  %1044 = vst [vmem:[#allocation3] sm:$0x3] %v1041_v17 }
 0x3b7   :  { %v2118_v53 = vpop.eup %2117 }
 0x3b8   :  { %v1043_v48 = vmul.f32 %v2118_v53, %v1035_v30 }
 0x3ba   :  { %1978 = vst [vmem:[%s2957_s7 + $0x6] sm:$0x3] %v1043_v48 }
 0x3bb   :  { %1045 = vst [vmem:[#allocation2] sm:$0x3] %v1043_v48 }
 0x3c2   :  { %v1050_v56 = vld [vmem:[#allocation2] sm:$0x3] }
 0x3c3   :  { %v1051_v14 = vpack.c.bf16 %v1050_v56, %v1050_v56 }
 0x3c5   :  { %1060 = vmatmul.bf16.vlgmr.msra.gmra.mxu2 %v1051_v14  ;;  %1073 = vmatmul.bf16.vlgmr.msra.gmra.mxu3 %v1051_v14 }
 0x3c6   :  { %1086 = vmatmul.bf16.vlgmr.msrb.gmra.mxu0 %v1051_v14  ;;  %1099 = vmatmul.bf16.vlgmr.msrb.gmra.mxu1 %v1051_v14 }
 0x3c7   :  { %1235 = vmatpush.bf16.msra.mxu2 %v2251_v6  ;;  %1248 = vmatpush.bf16.msra.mxu3 %v2262_v10 }
 0x3c8   :  { %1261 = vmatpush.bf16.msrb.mxu0 %v2264_v11  ;;  %1274 = vmatpush.bf16.msrb.mxu1 %v2276_v15 }
 0x3cb   :  { %1236 = vmatpush.bf16.msra.mxu2 %v2289_v19  ;;  %1249 = vmatpush.bf16.msra.mxu3 %v2291_v20 }
 0x3cc   :  { %1262 = vmatpush.bf16.msrb.mxu0 %v2303_v24  ;;  %1275 = vmatpush.bf16.msrb.mxu1 %v2314_v28 }
 0x3cf   :  { %1237 = vmatpush.bf16.msra.mxu2 %v2326_v32  ;;  %1250 = vmatpush.bf16.msra.mxu3 %v2339_v36 }
 0x3d0   :  { %1263 = vmatpush.bf16.msrb.mxu0 %v2341_v37  ;;  %1276 = vmatpush.bf16.msrb.mxu1 %v2344_v38 }
 0x3d3   :  { %1238 = vmatpush.bf16.msra.mxu2 %v2359_v42  ;;  %1251 = vmatpush.bf16.msra.mxu3 %v2370_v46 }
 0x3d4   :  { %1264 = vmatpush.bf16.msrb.mxu0 %v2372_v47  ;;  %1277 = vmatpush.bf16.msrb.mxu1 %v2381_v50 }
 0x3d5   :  { %1980 = vmatmul.msk.bf16.vlgmr.msrb.gmra.mxu2 %vm372_vm1, %v1979_v12  ;;  %1981 = vmatmul.msk.bf16.vlgmr.msrb.gmra.mxu3 %vm372_vm1, %v1979_v12 }
 0x3d6   :  { %1982 = vmatmul.msk.bf16.vlgmr.msra.gmra.mxu0 %vm372_vm1, %v1979_v12  ;;  %1983 = vmatmul.msk.bf16.vlgmr.msra.gmra.mxu1 %vm372_vm1, %v1979_v12 }
 0x3d7   :  { %1239 = vmatpush.bf16.msra.mxu2 %v2395_v54  ;;  %1252 = vmatpush.bf16.msra.mxu3 %v2406_v58 }
 0x3d8   :  { %1265 = vmatpush.bf16.msrb.mxu0 %v2408_v59  ;;  %1278 = vmatpush.bf16.msrb.mxu1 %v2417_v62 }
 0x3db   :  { %1240 = vmatpush.bf16.msra.mxu2 %v2431_v2  ;;  %1253 = vmatpush.bf16.msra.mxu3 %v2442_v7 }
 0x3dc   :  { %1266 = vmatpush.bf16.msrb.mxu0 %v2444_v8  ;;  %1279 = vmatpush.bf16.msrb.mxu1 %v2453_v13 }
 0x3df   :  { %1241 = vmatpush.bf16.msra.mxu2 %v2467_v18  ;;  %1254 = vmatpush.bf16.msra.mxu3 %v2478_v25 }
 0x3e0   :  { %1267 = vmatpush.bf16.msrb.mxu0 %v2480_v26  ;;  %1280 = vmatpush.bf16.msrb.mxu1 %v2492_v31 }
 0x3e3   :  { %1242 = vmatpush.bf16.msra.mxu2 %v2505_v39  ;;  %1255 = vmatpush.bf16.msra.mxu3 %v2507_v40 }
 0x3e4   :  { %1268 = vmatpush.bf16.msrb.mxu0 %v2519_v45  ;;  %1281 = vmatpush.bf16.msrb.mxu1 %v2524_v49 }
 0x3e7   :  { %1297 = vmatpush.bf16.msrb.mxu2 %v2539_v55  ;;  %1310 = vmatpush.bf16.msrb.mxu3 %v2550_v61 }
 0x3e8   :  { %1323 = vmatpush.bf16.msra.mxu0 %v2552_v63  ;;  %1336 = vmatpush.bf16.msra.mxu1 %v2561_v3 }
 0x443   :  { %v1087_v35 = vpop.f32.mrf.mxu0  ;;  %v1100_v27 = vpop.f32.mrf.mxu1 }
 0x448   :  { %v1061_v5 = vpop.f32.mrf.mxu2  ;;  %v1074_v60 = vpop.f32.mrf.mxu3 }
 0x44b   :  { %v1089_v22 = vpop.f32.mrf.mxu0  ;;  %v1102_v43 = vpop.f32.mrf.mxu1 }
 0x450   :  { %v1063_v41 = vpop.f32.mrf.mxu2  ;;  %v1076_v44 = vpop.f32.mrf.mxu3 }
 0x453   :  { %v1142_v51 = vpop.f32.mrf.mxu0  ;;  %v1155_v33 = vpop.f32.mrf.mxu1 }
 0x454   :  { %v1143_v23 = vadd.f32 %v1142_v51, %v1087_v35 }
 0x456   :  { %v1161_v29 = vadd.f32 %v1143_v23, %v2615_v52 }
 0x458   :  { %v1986_v9 = vmul.f32 -1.442695, %v1161_v29  ;;  %v1116_v1 = vpop.f32.mrf.mxu2  ;;  %v1129_v0 = vpop.f32.mrf.mxu3  ;;  %v2980_v29 = vld [vmem:[#allocation6_spill] sm:$0xff] }
 0x459   :  { %v1117_v17 = vadd.f32 %v1116_v1, %v1061_v5  ;;  %v1130_v34 = vadd.f32 %v1129_v0, %v1074_v60  ;;  %v1156_v60 = vadd.f32 %v1155_v33, %v1100_v27 }
 0x45a   :  { %2119 = vpow2.f32 %v1986_v9 }
 0x45b   :  { %v1159_v4 = vadd.f32 %v1117_v17, %v2978_v57  ;;  %v1160_v21 = vadd.f32 %v1130_v34, %v2979_v16  ;;  %v1144_v53 = vpop.f32.mrf.mxu0  ;;  %v1157_v30 = vpop.f32.mrf.mxu1  ;;  %v1162_v9 = vadd.f32 %v1156_v60, %v2980_v29  ;;  %v1221_v16 = vld [vmem:[#allocation3] sm:$0x3] }
 0x45d   :  { %v1984_v48 = vmul.f32 -1.442695, %v1159_v4  ;;  %v1985_v56 = vmul.f32 -1.442695, %v1160_v21 }
 0x45f   :  { %2121 = vpow2.f32 %v1984_v48 }
 0x460   :  { %v2120_v14 = vpop.eup %2119  ;;  %2123 = vpow2.f32 %v1985_v56  ;;  %v1118_v12 = vpop.f32.mrf.mxu2 }
 0x461   :  { %v1131_v35 = vpop.f32.mrf.mxu3  ;;  %v1174_v22 = vadd.f32 1.0, %v2120_v14 }
 0x463   :  { %2125 = vrcp.f32 %v1174_v22  ;;  %vm1210_vm14 = vweird.f32 %v1174_v22 }
 0x465   :  { %v2122_v43 = vpop.eup %2121 }
 0x466   :  { %v2124_v41 = vpop.eup %2123  ;;  %v1172_v44 = vadd.f32 1.0, %v2122_v43 }
 0x467   :  { %v1173_v5 = vadd.f32 1.0, %v2124_v41 }
 0x468   :  { %2127 = vrcp.f32 %v1172_v44  ;;  %v1186_v21 = vand.u32 2147483648, %v1172_v44  ;;  %v1184_v48 = vand.u32 2147483647, %v1172_v44  ;;  %vm1180_vm7 = vweird.f32 %v1172_v44 }
 0x469   :  { %2129 = vrcp.f32 %v1173_v5  ;;  %v2126_v51 = vpop.eup %2125  ;;  %v1201_v56 = vand.u32 2147483648, %v1173_v5  ;;  %v1199_v12 = vand.u32 2147483647, %v1173_v5  ;;  %vm1195_vm9 = vweird.f32 %v1173_v5 }
 0x46a   :  { %v1206_v34 = vmul.f32 %v2126_v51, %v1174_v22  ;;  %2131 = vtanh.f32 %v1162_v9  ;;  %v1187_v35 = vor.u32 1.1754944e-38, %v1186_v21  ;;  %vm1185_vm10 = vcmp.eq.f32.partialorder %v1184_v48, 8.507059e+37 }
 0x46b   :  { %v1202_v60 = vor.u32 1.1754944e-38, %v1201_v56  ;;  %vm1200_vm12 = vcmp.eq.f32.partialorder %v1199_v12, 8.507059e+37  ;;  %vm1211_vm13 = vweird.f32 %v2126_v51 }
 0x46c   :  { %v1207_v27 = vsub.f32 1.0, %v1206_v34  ;;  %vm1212_vm15 = vmor %vm1210_vm14, %vm1211_vm13 }
 0x46e   :  { %v2128_v23 = vpop.eup %2127 }
 0x46f   :  { %v2130_v1 = vpop.eup %2129  ;;  %v1176_v0 = vmul.f32 %v2128_v23, %v1172_v44  ;;  %vm1181_vm5 = vweird.f32 %v2128_v23  ;;  %v1216_v44 = vand.u32 2147483648, %v1174_v22 }
 0x470   :  { %v1191_v17 = vmul.f32 %v2130_v1, %v1173_v5  ;;  %vm1196_vm6 = vweird.f32 %v2130_v1  ;;  %vm1182_vm8 = vmor %vm1180_vm7, %vm1181_vm5  ;;  %v2132_v9 = vpop.eup %2131  ;;  %v1214_v5 = vand.u32 2147483647, %v1174_v22  ;;  %v1988_v22 = vld [vmem:[%s2955_s0 + $0x5] sm:$0x1] }
 0x471   :  { %v1177_v4 = vsub.f32 1.0, %v1176_v0  ;;  %vm1197_vm11 = vmor %vm1195_vm9, %vm1196_vm6  ;;  %v1217_v21 = vor.u32 1.1754944e-38, %v1216_v44  ;;  %v2981_v44 = vld [vmem:[#allocation4_spill] sm:$0xff] }
 0x472   :  { %v1192_v53 = vsub.f32 1.0, %v1191_v17  ;;  %vm1215_vm0 = vcmp.eq.f32.partialorder %v1214_v5, 8.507059e+37 }
 0x473   :  { %v1178_v30 = vmul.f32 %v2128_v23, %v1177_v4  ;;  %v1208_v4 = vmul.f32 %v2126_v51, %v1207_v27 }
 0x474   :  { %v1193_v14 = vmul.f32 %v2130_v1, %v1192_v53 }
 0x475   :  { %v1179_v33 = vadd.f32 %v2128_v23, %v1178_v30  ;;  %v1209_v30 = vadd.f32 %v2126_v51, %v1208_v4 }
 0x476   :  { %v1194_v43 = vadd.f32 %v2130_v1, %v1193_v14 }
 0x477   :  { %v1183_v41 = vsel %vm1182_vm8, %v2128_v23, %v1179_v33  ;;  %v1213_v23 = vsel %vm1212_vm15, %v2126_v51, %v1209_v30 }
 0x478   :  { %v1188_v0 = vsel %vm1185_vm10, %v1187_v35, %v1183_v41  ;;  %v1198_v17 = vsel %vm1197_vm11, %v2130_v1, %v1194_v43  ;;  %v1218_v1 = vsel %vm1215_vm0, %v1217_v21, %v1213_v23  ;;  %v2982_v23 = vld [vmem:[#allocation5_spill] sm:$0xff] }
 0x479   :  { %v1223_v29 = vmul.f32 %v2132_v9, %v1188_v0  ;;  %v1203_v53 = vsel %vm1200_vm12, %v1202_v60, %v1198_v17 }
 0x47a   :  { %v1222_v57 = vmul.f32 %v1221_v16, %v1203_v53 }
 0x47c   :  { %v1224_v34 = vadd.f32 %v1223_v29, %v1222_v57 }
 0x47e   :  { %2133 = vtanh.f32 %v1224_v34  ;;  %1227 = vst [vmem:[#allocation3] sm:$0x3] %v1224_v34 }
 0x484   :  { %v2134_v48 = vpop.eup %2133 }
 0x485   :  { %v1226_v56 = vmul.f32 %v2134_v48, %v1218_v1 }
 0x487   :  { %1987 = vst [vmem:[%s2957_s7 + $0x8] sm:$0x3] %v1226_v56 }
 0x488   :  { %1228 = vst [vmem:[#allocation2] sm:$0x3] %v1226_v56 }
 0x48f   :  { %v1233_v57 = vld [vmem:[#allocation2] sm:$0x3] }
 0x490   :  { %v1234_v16 = vpack.c.bf16 %v1233_v57, %v1233_v57 }
 0x492   :  { %1243 = vmatmul.bf16.vlgmr.msra.gmra.mxu2 %v1234_v16  ;;  %1256 = vmatmul.bf16.vlgmr.msra.gmra.mxu3 %v1234_v16 }
 0x493   :  { %1269 = vmatmul.bf16.vlgmr.msrb.gmra.mxu0 %v1234_v16  ;;  %1282 = vmatmul.bf16.vlgmr.msrb.gmra.mxu1 %v1234_v16 }
 0x494   :  { %1418 = vmatpush.bf16.msra.mxu2 %v2251_v6  ;;  %1431 = vmatpush.bf16.msra.mxu3 %v2262_v10 }
 0x495   :  { %1444 = vmatpush.bf16.msrb.mxu0 %v2264_v11  ;;  %1457 = vmatpush.bf16.msrb.mxu1 %v2276_v15 }
 0x498   :  { %1419 = vmatpush.bf16.msra.mxu2 %v2289_v19  ;;  %1432 = vmatpush.bf16.msra.mxu3 %v2291_v20 }
 0x499   :  { %1445 = vmatpush.bf16.msrb.mxu0 %v2303_v24  ;;  %1458 = vmatpush.bf16.msrb.mxu1 %v2314_v28 }
 0x49c   :  { %1420 = vmatpush.bf16.msra.mxu2 %v2326_v32  ;;  %1433 = vmatpush.bf16.msra.mxu3 %v2339_v36 }
 0x49d   :  { %1446 = vmatpush.bf16.msrb.mxu0 %v2341_v37  ;;  %1459 = vmatpush.bf16.msrb.mxu1 %v2344_v38 }
 0x4a0   :  { %1421 = vmatpush.bf16.msra.mxu2 %v2359_v42  ;;  %1434 = vmatpush.bf16.msra.mxu3 %v2370_v46 }
 0x4a1   :  { %1447 = vmatpush.bf16.msrb.mxu0 %v2372_v47  ;;  %1460 = vmatpush.bf16.msrb.mxu1 %v2381_v50 }
 0x4a2   :  { %1989 = vmatmul.msk.bf16.vlgmr.msrb.gmra.mxu2 %vm372_vm1, %v1988_v22  ;;  %1990 = vmatmul.msk.bf16.vlgmr.msrb.gmra.mxu3 %vm372_vm1, %v1988_v22 }
 0x4a3   :  { %1991 = vmatmul.msk.bf16.vlgmr.msra.gmra.mxu0 %vm372_vm1, %v1988_v22  ;;  %1992 = vmatmul.msk.bf16.vlgmr.msra.gmra.mxu1 %vm372_vm1, %v1988_v22 }
 0x4a4   :  { %1422 = vmatpush.bf16.msra.mxu2 %v2395_v54  ;;  %1435 = vmatpush.bf16.msra.mxu3 %v2406_v58 }
 0x4a5   :  { %1448 = vmatpush.bf16.msrb.mxu0 %v2408_v59  ;;  %1461 = vmatpush.bf16.msrb.mxu1 %v2417_v62 }
 0x4a8   :  { %1423 = vmatpush.bf16.msra.mxu2 %v2431_v2  ;;  %1436 = vmatpush.bf16.msra.mxu3 %v2442_v7 }
 0x4a9   :  { %1449 = vmatpush.bf16.msrb.mxu0 %v2444_v8  ;;  %1462 = vmatpush.bf16.msrb.mxu1 %v2453_v13 }
 0x4ac   :  { %1424 = vmatpush.bf16.msra.mxu2 %v2467_v18  ;;  %1437 = vmatpush.bf16.msra.mxu3 %v2478_v25 }
 0x4ad   :  { %1450 = vmatpush.bf16.msrb.mxu0 %v2480_v26  ;;  %1463 = vmatpush.bf16.msrb.mxu1 %v2492_v31 }
 0x4b0   :  { %1425 = vmatpush.bf16.msra.mxu2 %v2505_v39  ;;  %1438 = vmatpush.bf16.msra.mxu3 %v2507_v40 }
 0x4b1   :  { %1451 = vmatpush.bf16.msrb.mxu0 %v2519_v45  ;;  %1464 = vmatpush.bf16.msrb.mxu1 %v2524_v49 }
 0x4b4   :  { %1480 = vmatpush.bf16.msrb.mxu2 %v2539_v55  ;;  %1493 = vmatpush.bf16.msrb.mxu3 %v2550_v61 }
 0x4b5   :  { %1506 = vmatpush.bf16.msra.mxu0 %v2552_v63  ;;  %1519 = vmatpush.bf16.msra.mxu1 %v2561_v3 }
 0x510   :  { %v1270_v51 = vpop.f32.mrf.mxu0  ;;  %v1283_v29 = vpop.f32.mrf.mxu1 }
 0x515   :  { %v1244_v14 = vpop.f32.mrf.mxu2  ;;  %v1257_v12 = vpop.f32.mrf.mxu3 }
 0x518   :  { %v1272_v27 = vpop.f32.mrf.mxu0  ;;  %v1285_v33 = vpop.f32.mrf.mxu1 }
 0x51d   :  { %v1246_v35 = vpop.f32.mrf.mxu2  ;;  %v1259_v43 = vpop.f32.mrf.mxu3 }
 0x520   :  { %v1325_v41 = vpop.f32.mrf.mxu0  ;;  %v1338_v60 = vpop.f32.mrf.mxu1 }
 0x521   :  { %v1326_v9 = vadd.f32 %v1325_v41, %v1270_v51 }
 0x523   :  { %v1344_v0 = vadd.f32 %v1326_v9, %v2615_v52 }
 0x525   :  { %v1995_v17 = vmul.f32 -1.442695, %v1344_v0  ;;  %v1299_v4 = vpop.f32.mrf.mxu2  ;;  %v1312_v53 = vpop.f32.mrf.mxu3  ;;  %v2983_v0 = vld [vmem:[#allocation6_spill] sm:$0xff] }
 0x526   :  { %v1300_v34 = vadd.f32 %v1299_v4, %v1244_v14  ;;  %v1313_v30 = vadd.f32 %v1312_v53, %v1257_v12  ;;  %v1339_v12 = vadd.f32 %v1338_v60, %v1283_v29 }
 0x527   :  { %2135 = vpow2.f32 %v1995_v17 }
 0x528   :  { %v1342_v5 = vadd.f32 %v1300_v34, %v2981_v44  ;;  %v1343_v21 = vadd.f32 %v1313_v30, %v2982_v23  ;;  %v1327_v48 = vpop.f32.mrf.mxu0  ;;  %v1340_v1 = vpop.f32.mrf.mxu1  ;;  %v1345_v17 = vadd.f32 %v1339_v12, %v2983_v0  ;;  %v1404_v23 = vld [vmem:[#allocation3] sm:$0x3] }
 0x52a   :  { %v1993_v56 = vmul.f32 -1.442695, %v1342_v5  ;;  %v1994_v57 = vmul.f32 -1.442695, %v1343_v21 }
 0x52c   :  { %2137 = vpow2.f32 %v1993_v56 }
 0x52d   :  { %v2136_v16 = vpop.eup %2135  ;;  %2139 = vpow2.f32 %v1994_v57  ;;  %v1301_v22 = vpop.f32.mrf.mxu2 }
 0x52e   :  { %v1314_v51 = vpop.f32.mrf.mxu3  ;;  %v1357_v27 = vadd.f32 1.0, %v2136_v16 }
 0x530   :  { %2141 = vrcp.f32 %v1357_v27  ;;  %vm1393_vm11 = vweird.f32 %v1357_v27 }
 0x532   :  { %v2138_v33 = vpop.eup %2137 }
 0x533   :  { %v2140_v35 = vpop.eup %2139  ;;  %v1355_v43 = vadd.f32 1.0, %v2138_v33 }
 0x534   :  { %v1356_v14 = vadd.f32 1.0, %v2140_v35 }
 0x535   :  { %2143 = vrcp.f32 %v1355_v43  ;;  %v1369_v21 = vand.u32 2147483648, %v1355_v43  ;;  %v1367_v56 = vand.u32 2147483647, %v1355_v43  ;;  %vm1363_vm4 = vweird.f32 %v1355_v43 }
 0x536   :  { %2145 = vrcp.f32 %v1356_v14  ;;  %v2142_v41 = vpop.eup %2141  ;;  %v1384_v57 = vand.u32 2147483648, %v1356_v14  ;;  %v1382_v22 = vand.u32 2147483647, %v1356_v14  ;;  %vm1378_vm6 = vweird.f32 %v1356_v14 }
 0x537   :  { %v1389_v30 = vmul.f32 %v2142_v41, %v1357_v27  ;;  %2147 = vtanh.f32 %v1345_v17  ;;  %v1370_v51 = vor.u32 1.1754944e-38, %v1369_v21  ;;  %vm1368_vm7 = vcmp.eq.f32.partialorder %v1367_v56, 8.507059e+37 }
 0x538   :  { %v1385_v12 = vor.u32 1.1754944e-38, %v1384_v57  ;;  %vm1383_vm9 = vcmp.eq.f32.partialorder %v1382_v22, 8.507059e+37  ;;  %vm1394_vm10 = vweird.f32 %v2142_v41 }
 0x539   :  { %v1390_v29 = vsub.f32 1.0, %v1389_v30  ;;  %vm1395_vm12 = vmor %vm1393_vm11, %vm1394_vm10 }
 0x53b   :  { %v2144_v9 = vpop.eup %2143 }
 0x53c   :  { %v2146_v4 = vpop.eup %2145  ;;  %v1359_v53 = vmul.f32 %v2144_v9, %v1355_v43  ;;  %vm1364_vm2 = vweird.f32 %v2144_v9  ;;  %v1399_v43 = vand.u32 2147483648, %v1357_v27 }
 0x53d   :  { %v1374_v34 = vmul.f32 %v2146_v4, %v1356_v14  ;;  %vm1379_vm3 = vweird.f32 %v2146_v4  ;;  %vm1365_vm5 = vmor %vm1363_vm4, %vm1364_vm2  ;;  %v2148_v17 = vpop.eup %2147  ;;  %v1397_v14 = vand.u32 2147483647, %v1357_v27 }
 0x53e   :  { %v1360_v5 = vsub.f32 1.0, %v1359_v53  ;;  %vm1380_vm8 = vmor %vm1378_vm6, %vm1379_vm3  ;;  %v1400_v21 = vor.u32 1.1754944e-38, %v1399_v43 }
 0x53f   :  { %v1375_v48 = vsub.f32 1.0, %v1374_v34  ;;  %vm1398_vm13 = vcmp.eq.f32.partialorder %v1397_v14, 8.507059e+37 }
 0x540   :  { %v1361_v1 = vmul.f32 %v2144_v9, %v1360_v5  ;;  %v1391_v5 = vmul.f32 %v2142_v41, %v1390_v29 }
 0x541   :  { %v1376_v16 = vmul.f32 %v2146_v4, %v1375_v48 }
 0x542   :  { %v1362_v60 = vadd.f32 %v2144_v9, %v1361_v1  ;;  %v1392_v1 = vadd.f32 %v2142_v41, %v1391_v5 }
 0x543   :  { %v1377_v33 = vadd.f32 %v2146_v4, %v1376_v16 }
 0x544   :  { %v1366_v35 = vsel %vm1365_vm5, %v2144_v9, %v1362_v60  ;;  %v1396_v9 = vsel %vm1395_vm12, %v2142_v41, %v1392_v1  ;;  %v2986_v41 = vld [vmem:[#allocation6_spill] sm:$0xff] }
 0x545   :  { %v1371_v53 = vsel %vm1368_vm7, %v1370_v51, %v1366_v35  ;;  %v1381_v34 = vsel %vm1380_vm8, %v2146_v4, %v1377_v33  ;;  %v1401_v4 = vsel %vm1398_vm13, %v1400_v21, %v1396_v9 }
 0x546   :  { %v1406_v0 = vmul.f32 %v2148_v17, %v1371_v53  ;;  %v1386_v48 = vsel %vm1383_vm9, %v1385_v12, %v1381_v34 }
 0x547   :  { %v1405_v44 = vmul.f32 %v1404_v23, %v1386_v48 }
 0x549   :  { %v1407_v30 = vadd.f32 %v1406_v0, %v1405_v44 }
 0x54b   :  { %2149 = vtanh.f32 %v1407_v30  ;;  %1410 = vst [vmem:[#allocation3] sm:$0x3] %v1407_v30 }
 0x551   :  { %v2150_v56 = vpop.eup %2149 }
 0x552   :  { %v1409_v57 = vmul.f32 %v2150_v56, %v1401_v4 }
 0x554   :  { %1996 = vst [vmem:[%s2957_s7 + $0xa] sm:$0x3] %v1409_v57 }
 0x555   :  { %1411 = vst [vmem:[#allocation2] sm:$0x3] %v1409_v57 }
 0x55c   :  { %v1416_v44 = vld [vmem:[#allocation2] sm:$0x3] }
 0x55d   :  { %v1417_v23 = vpack.c.bf16 %v1416_v44, %v1416_v44 }
 0x55f   :  { %1426 = vmatmul.bf16.vlgmr.msra.gmra.mxu2 %v1417_v23  ;;  %1439 = vmatmul.bf16.vlgmr.msra.gmra.mxu3 %v1417_v23 }
 0x560   :  { %1452 = vmatmul.bf16.vlgmr.msrb.gmra.mxu0 %v1417_v23  ;;  %1465 = vmatmul.bf16.vlgmr.msrb.gmra.mxu1 %v1417_v23 }
 0x561   :  { %1601 = vmatpush.bf16.msra.mxu2 %v2251_v6  ;;  %1614 = vmatpush.bf16.msra.mxu3 %v2262_v10  ;;  %v1997_v6 = vld [vmem:[%s2955_s0 + $0x6] sm:$0x1] }
 0x562   :  { %1627 = vmatpush.bf16.msrb.mxu0 %v2264_v11  ;;  %1640 = vmatpush.bf16.msrb.mxu1 %v2276_v15 }
 0x565   :  { %1602 = vmatpush.bf16.msra.mxu2 %v2289_v19  ;;  %1615 = vmatpush.bf16.msra.mxu3 %v2291_v20 }
 0x566   :  { %1628 = vmatpush.bf16.msrb.mxu0 %v2303_v24  ;;  %1641 = vmatpush.bf16.msrb.mxu1 %v2314_v28 }
 0x569   :  { %1603 = vmatpush.bf16.msra.mxu2 %v2326_v32  ;;  %1616 = vmatpush.bf16.msra.mxu3 %v2339_v36 }
 0x56a   :  { %1629 = vmatpush.bf16.msrb.mxu0 %v2341_v37  ;;  %1642 = vmatpush.bf16.msrb.mxu1 %v2344_v38 }
 0x56d   :  { %1604 = vmatpush.bf16.msra.mxu2 %v2359_v42  ;;  %1617 = vmatpush.bf16.msra.mxu3 %v2370_v46 }
 0x56e   :  { %1630 = vmatpush.bf16.msrb.mxu0 %v2372_v47  ;;  %1643 = vmatpush.bf16.msrb.mxu1 %v2381_v50 }
 0x56f   :  { %1998 = vmatmul.msk.bf16.vlgmr.msrb.gmra.mxu2 %vm372_vm1, %v1997_v6  ;;  %1999 = vmatmul.msk.bf16.vlgmr.msrb.gmra.mxu3 %vm372_vm1, %v1997_v6 }
 0x570   :  { %2000 = vmatmul.msk.bf16.vlgmr.msra.gmra.mxu0 %vm372_vm1, %v1997_v6  ;;  %2001 = vmatmul.msk.bf16.vlgmr.msra.gmra.mxu1 %vm372_vm1, %v1997_v6  ;;  %v1587_v6 = vld [vmem:[#allocation3] sm:$0x3] }
 0x571   :  { %1605 = vmatpush.bf16.msra.mxu2 %v2395_v54  ;;  %1618 = vmatpush.bf16.msra.mxu3 %v2406_v58 }
 0x572   :  { %1631 = vmatpush.bf16.msrb.mxu0 %v2408_v59  ;;  %1644 = vmatpush.bf16.msrb.mxu1 %v2417_v62  ;;  %v2984_v59 = vld [vmem:[#allocation4_spill] sm:$0xff] }
 0x575   :  { %1606 = vmatpush.bf16.msra.mxu2 %v2431_v2  ;;  %1619 = vmatpush.bf16.msra.mxu3 %v2442_v7  ;;  %v2985_v2 = vld [vmem:[#allocation5_spill] sm:$0xff] }
 0x576   :  { %1632 = vmatpush.bf16.msrb.mxu0 %v2444_v8  ;;  %1645 = vmatpush.bf16.msrb.mxu1 %v2453_v13 }
 0x579   :  { %1607 = vmatpush.bf16.msra.mxu2 %v2467_v18  ;;  %1620 = vmatpush.bf16.msra.mxu3 %v2478_v25 }
 0x57a   :  { %1633 = vmatpush.bf16.msrb.mxu0 %v2480_v26  ;;  %1646 = vmatpush.bf16.msrb.mxu1 %v2492_v31 }
 0x57d   :  { %1608 = vmatpush.bf16.msra.mxu2 %v2505_v39  ;;  %1621 = vmatpush.bf16.msra.mxu3 %v2507_v40 }
 0x57e   :  { %1634 = vmatpush.bf16.msrb.mxu0 %v2519_v45  ;;  %1647 = vmatpush.bf16.msrb.mxu1 %v2524_v49 }
 0x581   :  { %1663 = vmatpush.bf16.msrb.mxu2 %v2539_v55  ;;  %1676 = vmatpush.bf16.msrb.mxu3 %v2550_v61 }
 0x582   :  { %1689 = vmatpush.bf16.msra.mxu0 %v2552_v63  ;;  %1702 = vmatpush.bf16.msra.mxu1 %v2561_v3 }
 0x5dd   :  { %v1453_v10 = vpop.f32.mrf.mxu0  ;;  %v1466_v11 = vpop.f32.mrf.mxu1 }
 0x5e2   :  { %v1427_v15 = vpop.f32.mrf.mxu2  ;;  %v1440_v19 = vpop.f32.mrf.mxu3 }
 0x5e5   :  { %v1455_v20 = vpop.f32.mrf.mxu0  ;;  %v1468_v24 = vpop.f32.mrf.mxu1 }
 0x5ea   :  { %v1429_v28 = vpop.f32.mrf.mxu2  ;;  %v1442_v32 = vpop.f32.mrf.mxu3 }
 0x5ed   :  { %v1508_v36 = vpop.f32.mrf.mxu0  ;;  %v1521_v37 = vpop.f32.mrf.mxu1 }
 0x5ee   :  { %v1509_v38 = vadd.f32 %v1508_v36, %v1453_v10  ;;  %v1522_v63 = vadd.f32 %v1521_v37, %v1466_v11 }
 0x5f0   :  { %v1527_v42 = vadd.f32 %v1509_v38, %v2615_v52  ;;  %v1528_v0 = vadd.f32 %v1522_v63, %v2986_v41 }
 0x5f2   :  { %v2004_v46 = vmul.f32 -1.442695, %v1527_v42  ;;  %v1482_v47 = vpop.f32.mrf.mxu2  ;;  %v1495_v50 = vpop.f32.mrf.mxu3 }
 0x5f3   :  { %v1483_v54 = vadd.f32 %v1482_v47, %v1427_v15  ;;  %v1496_v58 = vadd.f32 %v1495_v50, %v1440_v19 }
 0x5f4   :  { %2151 = vpow2.f32 %v2004_v46  ;;  %v2006_v46 = vld [vmem:[%s2955_s0 + $0x7] sm:$0x1] }
 0x5f5   :  { %v1525_v62 = vadd.f32 %v1483_v54, %v2984_v59  ;;  %v1526_v7 = vadd.f32 %v1496_v58, %v2985_v2  ;;  %v1510_v8 = vpop.f32.mrf.mxu0  ;;  %v1523_v13 = vpop.f32.mrf.mxu1 }
 0x5f7   :  { %v2002_v18 = vmul.f32 -1.442695, %v1525_v62  ;;  %v2003_v25 = vmul.f32 -1.442695, %v1526_v7 }
 0x5f9   :  { %2153 = vpow2.f32 %v2002_v18 }
 0x5fa   :  { %v2152_v26 = vpop.eup %2151  ;;  %2155 = vpow2.f32 %v2003_v25  ;;  %v1484_v31 = vpop.f32.mrf.mxu2 }
 0x5fb   :  { %v1497_v39 = vpop.f32.mrf.mxu3  ;;  %v1540_v40 = vadd.f32 1.0, %v2152_v26 }
 0x5fd   :  { %2157 = vrcp.f32 %v1540_v40  ;;  %v1582_v19 = vand.u32 2147483648, %v1540_v40  ;;  %vm1576_vm8 = vweird.f32 %v1540_v40  ;;  %v1580_v20 = vand.u32 2147483647, %v1540_v40 }
 0x5ff   :  { %v2154_v45 = vpop.eup %2153  ;;  %v1583_v28 = vor.u32 1.1754944e-38, %v1582_v19  ;;  %vm1581_vm10 = vcmp.eq.f32.partialorder %v1580_v20, 8.507059e+37 }
 0x600   :  { %v2156_v49 = vpop.eup %2155  ;;  %v1538_v55 = vadd.f32 1.0, %v2154_v45 }
 0x601   :  { %v1539_v61 = vadd.f32 1.0, %v2156_v49 }
 0x602   :  { %2159 = vrcp.f32 %v1538_v55  ;;  %v1552_v33 = vand.u32 2147483648, %v1538_v55  ;;  %v1550_v17 = vand.u32 2147483647, %v1538_v55  ;;  %vm1546_vm0 = vweird.f32 %v1538_v55 }
 0x603   :  { %2161 = vrcp.f32 %v1539_v61  ;;  %v2158_v3 = vpop.eup %2157  ;;  %v1567_v53 = vand.u32 2147483648, %v1539_v61  ;;  %v1565_v5 = vand.u32 2147483647, %v1539_v61  ;;  %vm1561_vm3 = vweird.f32 %v1539_v61 }
 0x604   :  { %v1572_v60 = vmul.f32 %v2158_v3, %v1540_v40  ;;  %2163 = vtanh.f32 %v1528_v0  ;;  %v1553_v1 = vor.u32 1.1754944e-38, %v1552_v33  ;;  %vm1551_vm4 = vcmp.eq.f32.partialorder %v1550_v17, 8.507059e+37 }
 0x605   :  { %v1568_v9 = vor.u32 1.1754944e-38, %v1567_v53  ;;  %vm1566_vm6 = vcmp.eq.f32.partialorder %v1565_v5, 8.507059e+37  ;;  %vm1577_vm7 = vweird.f32 %v2158_v3 }
 0x606   :  { %v1573_v48 = vsub.f32 1.0, %v1572_v60  ;;  %vm1578_vm9 = vmor %vm1576_vm8, %vm1577_vm7 }
 0x608   :  { %v2160_v27 = vpop.eup %2159  ;;  %v1574_v57 = vmul.f32 %v2158_v3, %v1573_v48 }
 0x609   :  { %v2162_v16 = vpop.eup %2161  ;;  %v1542_v22 = vmul.f32 %v2160_v27, %v1538_v55  ;;  %vm1547_vm14 = vweird.f32 %v2160_v27 }
 0x60a   :  { %v1557_v29 = vmul.f32 %v2162_v16, %v1539_v61  ;;  %vm1562_vm15 = vweird.f32 %v2162_v16  ;;  %vm1548_vm2 = vmor %vm1546_vm0, %vm1547_vm14  ;;  %v2164_v21 = vpop.eup %2163  ;;  %v1575_v15 = vadd.f32 %v2158_v3, %v1574_v57 }
 0x60b   :  { %v1543_v51 = vsub.f32 1.0, %v1542_v22  ;;  %vm1563_vm5 = vmor %vm1561_vm3, %vm1562_vm15 }
 0x60c   :  { %v1558_v35 = vsub.f32 1.0, %v1557_v29  ;;  %v1579_v24 = vsel %vm1578_vm9, %v2158_v3, %v1575_v15 }
 0x60d   :  { %v1544_v12 = vmul.f32 %v2160_v27, %v1543_v51  ;;  %v1584_v36 = vsel %vm1581_vm10, %v1583_v28, %v1579_v24 }
 0x60e   :  { %v1559_v34 = vmul.f32 %v2162_v16, %v1558_v35 }
 0x60f   :  { %v1545_v30 = vadd.f32 %v2160_v27, %v1544_v12 }
 0x610   :  { %v1560_v43 = vadd.f32 %v2162_v16, %v1559_v34 }
 0x611   :  { %v1549_v14 = vsel %vm1548_vm2, %v2160_v27, %v1545_v30 }
 0x612   :  { %v1554_v56 = vsel %vm1551_vm4, %v1553_v1, %v1549_v14  ;;  %v1564_v4 = vsel %vm1563_vm5, %v2162_v16, %v1560_v43 }
 0x613   :  { %v1589_v44 = vmul.f32 %v2164_v21, %v1554_v56  ;;  %v1569_v23 = vsel %vm1566_vm6, %v1568_v9, %v1564_v4 }
 0x614   :  { %v1588_v10 = vmul.f32 %v1587_v6, %v1569_v23 }
 0x616   :  { %v1590_v11 = vadd.f32 %v1589_v44, %v1588_v10 }
 0x618   :  { %2165 = vtanh.f32 %v1590_v11  ;;  %1593 = vst [vmem:[#allocation3] sm:$0x3] %v1590_v11 }
 0x61e   :  { %v2166_v32 = vpop.eup %2165 }
 0x61f   :  { %v1592_v37 = vmul.f32 %v2166_v32, %v1584_v36  ;;  %v1770_v36 = vld [vmem:[#allocation3] sm:$0x3] }
 0x621   :  { %2005 = vst [vmem:[%s2957_s7 + $0xc] sm:$0x3] %v1592_v37 }
 0x622   :  { %1594 = vst [vmem:[#allocation2] sm:$0x3] %v1592_v37 }
 0x629   :  { %v1599_v38 = vld [vmem:[#allocation2] sm:$0x3] }
 0x62a   :  { %v1600_v42 = vpack.c.bf16 %v1599_v38, %v1599_v38 }
 0x62c   :  { %1609 = vmatmul.bf16.vlgmr.msra.gmra.mxu2 %v1600_v42  ;;  %1622 = vmatmul.bf16.vlgmr.msra.gmra.mxu3 %v1600_v42 }
 0x62d   :  { %1635 = vmatmul.bf16.vlgmr.msrb.gmra.mxu0 %v1600_v42  ;;  %1648 = vmatmul.bf16.vlgmr.msrb.gmra.mxu1 %v1600_v42 }
 0x63c   :  { %2007 = vmatmul.msk.bf16.vlgmr.msrb.gmra.mxu2 %vm372_vm1, %v2006_v46  ;;  %2008 = vmatmul.msk.bf16.vlgmr.msrb.gmra.mxu3 %vm372_vm1, %v2006_v46 }
 0x63d   :  { %2009 = vmatmul.msk.bf16.vlgmr.msra.gmra.mxu0 %vm372_vm1, %v2006_v46  ;;  %2010 = vmatmul.msk.bf16.vlgmr.msra.gmra.mxu1 %vm372_vm1, %v2006_v46 }
 0x6aa   :  { %v1636_v47 = vpop.f32.mrf.mxu0  ;;  %v1649_v50 = vpop.f32.mrf.mxu1 }
 0x6af   :  { %v1610_v54 = vpop.f32.mrf.mxu2  ;;  %v1623_v58 = vpop.f32.mrf.mxu3 }
 0x6b2   :  { %v1638_v62 = vpop.f32.mrf.mxu0  ;;  %v1651_v7 = vpop.f32.mrf.mxu1 }
 0x6b7   :  { %v1612_v8 = vpop.f32.mrf.mxu2  ;;  %v1625_v13 = vpop.f32.mrf.mxu3 }
 0x6ba   :  { %v1691_v18 = vpop.f32.mrf.mxu0  ;;  %v1704_v25 = vpop.f32.mrf.mxu1 }
 0x6bb   :  { %v1692_v26 = vadd.f32 %v1691_v18, %v1636_v47 }
 0x6bd   :  { %v1710_v31 = vadd.f32 %v1692_v26, %v2615_v52 }
 0x6bf   :  { %v2013_v39 = vmul.f32 -1.442695, %v1710_v31  ;;  %v1665_v40 = vpop.f32.mrf.mxu2  ;;  %v1678_v45 = vpop.f32.mrf.mxu3 }
 0x6c0   :  { %v1666_v49 = vadd.f32 %v1665_v40, %v1610_v54  ;;  %v1679_v55 = vadd.f32 %v1678_v45, %v1623_v58 }
 0x6c1   :  { %2167 = vpow2.f32 %v2013_v39 }
 0x6c2   :  { %v1708_v61 = vadd.f32 %v1666_v49, %v2984_v59  ;;  %v1709_v63 = vadd.f32 %v1679_v55, %v2985_v2  ;;  %v1693_v3 = vpop.f32.mrf.mxu0  ;;  %v1706_v27 = vpop.f32.mrf.mxu1  ;;  %v1705_v59 = vadd.f32 %v1704_v25, %v1649_v50 }
 0x6c4   :  { %v2011_v0 = vmul.f32 -1.442695, %v1708_v61  ;;  %v2012_v16 = vmul.f32 -1.442695, %v1709_v63  ;;  %v1711_v53 = vadd.f32 %v1705_v59, %v2986_v41 }
 0x6c6   :  { %2169 = vpow2.f32 %v2011_v0 }
 0x6c7   :  { %v2168_v22 = vpop.eup %2167  ;;  %2171 = vpow2.f32 %v2012_v16  ;;  %v1667_v29 = vpop.f32.mrf.mxu2 }
 0x6c8   :  { %v1680_v60 = vpop.f32.mrf.mxu3  ;;  %v1723_v52 = vadd.f32 1.0, %v2168_v22 }
 0x6ca   :  { %2173 = vrcp.f32 %v1723_v52  ;;  %v1765_v46 = vand.u32 2147483648, %v1723_v52  ;;  %vm1759_vm4 = vweird.f32 %v1723_v52  ;;  %v1763_v47 = vand.u32 2147483647, %v1723_v52 }
 0x6cc   :  { %v2170_v51 = vpop.eup %2169  ;;  %v1766_v54 = vor.u32 1.1754944e-38, %v1765_v46  ;;  %vm1764_vm6 = vcmp.eq.f32.partialorder %v1763_v47, 8.507059e+37 }
 0x6cd   :  { %v2172_v33 = vpop.eup %2171  ;;  %v1721_v35 = vadd.f32 1.0, %v2170_v51 }
 0x6ce   :  { %v1722_v12 = vadd.f32 1.0, %v2172_v33 }
 0x6cf   :  { %2175 = vrcp.f32 %v1721_v35  ;;  %v1735_v43 = vand.u32 2147483648, %v1721_v35  ;;  %v1733_v21 = vand.u32 2147483647, %v1721_v35  ;;  %vm1729_vm12 = vweird.f32 %v1721_v35 }
 0x6d0   :  { %2177 = vrcp.f32 %v1722_v12  ;;  %v2174_v17 = vpop.eup %2173  ;;  %v1750_v56 = vand.u32 2147483648, %v1722_v12  ;;  %v1748_v57 = vand.u32 2147483647, %v1722_v12  ;;  %vm1744_vm14 = vweird.f32 %v1722_v12 }
 0x6d1   :  { %v1755_v30 = vmul.f32 %v2174_v17, %v1723_v52  ;;  %2179 = vtanh.f32 %v1711_v53  ;;  %v1736_v41 = vor.u32 1.1754944e-38, %v1735_v43  ;;  %vm1734_vm15 = vcmp.eq.f32.partialorder %v1733_v21, 8.507059e+37 }
 0x6d2   :  { %v1751_v11 = vor.u32 1.1754944e-38, %v1750_v56  ;;  %vm1749_vm2 = vcmp.eq.f32.partialorder %v1748_v57, 8.507059e+37  ;;  %vm1760_vm3 = vweird.f32 %v2174_v17 }
 0x6d3   :  { %v1756_v44 = vsub.f32 1.0, %v1755_v30  ;;  %vm1761_vm5 = vmor %vm1759_vm4, %vm1760_vm3 }
 0x6d5   :  { %v2176_v2 = vpop.eup %2175  ;;  %v1757_v24 = vmul.f32 %v2174_v17, %v1756_v44 }
 0x6d6   :  { %v2178_v34 = vpop.eup %2177  ;;  %v1725_v5 = vmul.f32 %v2176_v2, %v1721_v35  ;;  %vm1730_vm1 = vweird.f32 %v2176_v2 }
 0x6d7   :  { %v1740_v48 = vmul.f32 %v2178_v34, %v1722_v12  ;;  %vm1745_vm11 = vweird.f32 %v2178_v34  ;;  %vm1731_vm13 = vmor %vm1729_vm12, %vm1730_vm1  ;;  %v2180_v15 = vpop.eup %2179  ;;  %v1758_v42 = vadd.f32 %v2174_v17, %v1757_v24 }
 0x6d8   :  { %v1726_v1 = vsub.f32 1.0, %v1725_v5  ;;  %vm1746_vm0 = vmor %vm1744_vm14, %vm1745_vm11 }
 0x6d9   :  { %v1741_v14 = vsub.f32 1.0, %v1740_v48  ;;  %v1762_v50 = vsel %vm1761_vm5, %v2174_v17, %v1758_v42 }
 0x6da   :  { %v1727_v9 = vmul.f32 %v2176_v2, %v1726_v1  ;;  %v1767_v62 = vsel %vm1764_vm6, %v1766_v54, %v1762_v50 }
 0x6db   :  { %v1742_v4 = vmul.f32 %v2178_v34, %v1741_v14 }
 0x6dc   :  { %v1728_v23 = vadd.f32 %v2176_v2, %v1727_v9 }
 0x6dd   :  { %v1743_v6 = vadd.f32 %v2178_v34, %v1742_v4 }
 0x6de   :  { %v1732_v10 = vsel %vm1731_vm13, %v2176_v2, %v1728_v23 }
 0x6df   :  { %v1737_v19 = vsel %vm1734_vm15, %v1736_v41, %v1732_v10  ;;  %v1747_v20 = vsel %vm1746_vm0, %v2178_v34, %v1743_v6 }
 0x6e0   :  { %v1772_v28 = vmul.f32 %v2180_v15, %v1737_v19  ;;  %v1752_v32 = vsel %vm1749_vm2, %v1751_v11, %v1747_v20 }
 0x6e1   :  { %v1771_v37 = vmul.f32 %v1770_v36, %v1752_v32 }
 0x6e3   :  { %v1773_v38 = vadd.f32 %v1772_v28, %v1771_v37 }
 0x6e5   :  { %2181 = vtanh.f32 %v1773_v38  ;;  %1776 = vst [vmem:[#allocation3] sm:$0x3] %v1773_v38 }
 0x6eb   :  { %v2182_v58 = vpop.eup %2181 }
 0x6ec   :  { %v1775_v7 = vmul.f32 %v2182_v58, %v1767_v62  ;;  %v1785_v8 = vld [vmem:[#allocation3] sm:$0x3] }
 0x6ed   :  { %1786 = vst [vmem:[%s2958_s9] sm:$0x3] %v1785_v8 }
 0x6ee   :  { %1777 = vst [vmem:[#allocation2] sm:$0x3] %v1775_v7 }
 0x6ef   :  { %2014 = vst [vmem:[%s2957_s7 + $0xe] sm:$0x3] %v1775_v7 }
 0x6f5   :  { %v1783_v13 = vld [vmem:[#allocation2] sm:$0x3] }
 0x6f6   :  { %1784 = vst [vmem:[%s2959_s8] sm:$0x3] %v1783_v13 }

</bundles_post_ra>
